<compile_context>
chip_gen: v7x
topology: tpu7x:2x2x1
jax: 0.10.0
libtpu: 0.0.40
codegen_flags: <defaults>
</compile_context>

<pallas_src>
import functools
import itertools

import numpy as np
import jax
import jax.numpy as jnp
from jax import lax
from jax.experimental import pallas as pl
from jax.experimental.pallas import tpu as pltpu


# ----------------------------------------------------------------------------
# Pallas kernel: in-kernel point-sample (iota one-hot + matmul, accumulated
# over HW tiles) + sigmoid-CE cost + dice cost + weighted combine.
# ----------------------------------------------------------------------------
def _matcher_cost_kernel(idx_ref, wgt_ref, pred_ref, tgt_ref, c_ref,
                         x_acc, t_acc, *, tk, ce_w, dice_w):
    # idx_ref : [P, 4] int32  flat bilinear tap indices (OOB taps have wgt 0)
    # wgt_ref : [P, 4] f32    bilinear tap weights
    # pred_ref: [Q, TK] bf16  prediction mask logits, HW tile k
    # tgt_ref : [T_pad, TK] bf16 binary target masks (zero-padded rows), tile k
    # c_ref   : [Q, T_pad] f32 output cost matrix (written at last k)
    # x_acc   : [Q, P] f32 VMEM accumulator of sampled prediction logits
    # t_acc   : [T_pad, P] f32 VMEM accumulator of sampled target masks
    k = pl.program_id(1)
    nk = pl.num_programs(1)

    @pl.when(k == 0)
    def _():
        x_acc[...] = jnp.zeros_like(x_acc)
        t_acc[...] = jnp.zeros_like(t_acc)

    # ---- build the [P, TK] slice of the bilinear sampling weight matrix in
    #      VMEM (no dense [P, HW] matrix shipped from HBM).
    p = idx_ref.shape[0]
    base = k * tk
    hw_iota = base + lax.broadcasted_iota(jnp.int32, (p, tk), 1)
    w = jnp.zeros((p, tk), jnp.float32)
    for tap in range(4):
        w = w + jnp.where(hw_iota == idx_ref[:, tap:tap + 1],
                          wgt_ref[:, tap:tap + 1], 0.0)
    w = w.astype(jnp.bfloat16)

    contract = (((1,), (1,)), ((), ()))   # lane-vs-lane contraction (no .T)

    # ---- point_sample as a matmul, accumulated over HW tiles (f32 acc)
    x_acc[...] += lax.dot_general(pred_ref[...], w, contract,
                                  preferred_element_type=jnp.float32)
    t_acc[...] += lax.dot_general(tgt_ref[...], w, contract,
                                  preferred_element_type=jnp.float32)

    # ---- epilogue: CE + dice costs on the sampled [.., P] tensors
    @pl.when(k == nk - 1)
    def _():
        x = x_acc[...]                    # [Q, P] sampled prediction logits
        t = t_acc[...]                    # [T_pad, P] sampled target masks

        # shared transcendental: one exp per element
        e = jnp.exp(-jnp.abs(x))
        softplus_x = jnp.maximum(x, 0.0) + jnp.log1p(e)       # = BCE(x, 0)
        inv = pl.reciprocal(1.0 + e, approx=True)
        s = jnp.where(x >= 0.0, inv, e * inv)                  # sigmoid(x)

        # batch_sigmoid_ce_loss:
        #   pos - neg = softplus(-x) - softplus(x) = -x, so
        #   ce_raw[n,m] = sum_p softplus(x)[n,p] - sum_p x[n,p] * t[m,p]
        #   (1/P is folded into ce_w at trace time)
        ce = (jnp.sum(softplus_x, axis=-1, keepdims=True)
              - lax.dot_general(x, t, contract,
                                preferred_element_type=jnp.float32))

        # batch_dice_loss
        num = 2.0 * lax.dot_general(s, t, contract,
                                    preferred_element_type=jnp.float32)
        ones_row = jnp.ones((1, x.shape[1]), jnp.float32)
        t_colsum = lax.dot_general(ones_row, t, contract,
                                   preferred_element_type=jnp.float32)  # [1,T]
        den = jnp.sum(s, axis=-1, keepdims=True) + t_colsum   # [Q,1]+[1,T]
        dice = 1.0 - (num + 1.0) * pl.reciprocal(den + 1.0, approx=True)

        # cost_class contribution is 0 in the reference forward (`if False:`)
        c_ref[...] = ce_w * ce + dice_w * dice


# ----------------------------------------------------------------------------
# Bilinear tap indices/weights (grid_sample, align_corners=False,
# padding_mode='zeros'):  point_coords [..., P, 2] -> ([..., P, 4] int32,
# [..., P, 4] f32).  OOB taps get weight 0 (clipped index).
# ----------------------------------------------------------------------------
def _bilinear_taps(point_coords, H, W):
    gx = point_coords[..., 0] * 2.0 - 1.0
    gy = point_coords[..., 1] * 2.0 - 1.0
    ix = ((gx + 1.0) * W - 1.0) * 0.5
    iy = ((gy + 1.0) * H - 1.0) * 0.5
    ix0 = jnp.floor(ix)
    iy0 = jnp.floor(iy)
    ix1 = ix0 + 1.0
    iy1 = iy0 + 1.0
    wx1 = ix - ix0
    wx0 = 1.0 - wx1
    wy1 = iy - iy0
    wy0 = 1.0 - wy1

    def tap(iy_, ix_, wgt):
        valid = ((iy_ >= 0) & (iy_ <= H - 1) & (ix_ >= 0) & (ix_ <= W - 1))
        iyc = jnp.clip(iy_, 0, H - 1).astype(jnp.int32)
        ixc = jnp.clip(ix_, 0, W - 1).astype(jnp.int32)
        return iyc * W + ixc, wgt * valid.astype(wgt.dtype)

    taps = [tap(iy0, ix0, wy0 * wx0), tap(iy0, ix1, wy0 * wx1),
            tap(iy1, ix0, wy1 * wx0), tap(iy1, ix1, wy1 * wx1)]
    idx = jnp.stack([t[0] for t in taps], axis=-1)   # [..., P, 4] int32
    wgt = jnp.stack([t[1] for t in taps], axis=-1)   # [..., P, 4] f32
    return idx, wgt


# ----------------------------------------------------------------------------
# One jitted pipeline: tap construction + single batched pallas_call.
# ----------------------------------------------------------------------------
@functools.partial(jax.jit, static_argnames=("cost_mask_w", "cost_dice_w"))
def _compute_cost_matrices(pred_masks, tgt_masks_padded, point_coords,
                           cost_mask_w, cost_dice_w):
    """pred_masks: [B, Q, H, W]; tgt_masks_padded: [B, T_pad, H, W];
    point_coords: [B, P, 2]  ->  cost matrices [B, Q, T_pad] (float32)."""
    B, Q, H, W = pred_masks.shape
    T_pad = tgt_masks_padded.shape[1]
    P = point_coords.shape[1]
    HW = H * W

    idx, wgt = _bilinear_taps(point_coords, H, W)          # [B,P,4] i32 / f32

    # bf16 matmul inputs (targets are exactly 0/1 -> lossless), f32 accumulate.
    pred_flat = pred_masks.reshape(B, Q, HW).astype(jnp.bfloat16)
    tgt_flat = tgt_masks_padded.reshape(B, T_pad, HW).astype(jnp.bfloat16)

    # HW reduction tile: largest 128-multiple divisor of HW, capped at 2048
    # (v7x-safe bf16 tile; also fine on v5e/v6e).
    if HW % 128 == 0:
        tk = 128
        for cand in (2048, 1024, 512, 256, 128):
            if HW % cand == 0:
                tk = cand
                break
    else:
        tk = HW
    nk = HW // tk

    kernel = functools.partial(
        _matcher_cost_kernel, tk=tk,
        ce_w=float(cost_mask_w) / float(P),   # fold 1/num_points at trace time
        dice_w=float(cost_dice_w))

    # VMEM budget: double-buffered input blocks + output block + accumulators.
    blk_bytes = (2 * (P * 4 * 4 + P * 4 * 4 + Q * tk * 2 + T_pad * tk * 2)
                 + 2 * Q * T_pad * 4
                 + (Q * P + T_pad * P) * 4)
    vmem_limit = int(min(max(2 * blk_bytes + (8 << 20), 32 << 20), 56 << 20))

    flops = B * (2 * (Q + T_pad) * HW * P + 4 * Q * P * T_pad + 2 * P * T_pad)
    transcendentals = B * (3 * Q * P + Q * T_pad)
    bytes_accessed = B * (P * 4 * 4 * 2 + Q * HW * 2 + T_pad * HW * 2
                          + Q * T_pad * 4)

    # TODO(synk): when B == 1 on v7x, add a second parallel grid axis (split
    # T_pad) so both TensorCores get work; also pad T_pad/Q to 256 on v6e/v7x.
    return pl.pallas_call(
        kernel,
        out_shape=jax.ShapeDtypeStruct((B, Q, T_pad), jnp.float32),
        grid=(B, nk),
        in_specs=[
            pl.BlockSpec((None, P, 4), lambda b, k: (b, 0, 0)),
            pl.BlockSpec((None, P, 4), lambda b, k: (b, 0, 0)),
            pl.BlockSpec((None, Q, tk), lambda b, k: (b, 0, k)),
            pl.BlockSpec((None, T_pad, tk), lambda b, k: (b, 0, k)),
        ],
        out_specs=pl.BlockSpec((None, Q, T_pad), lambda b, k: (b, 0, 0)),
        scratch_shapes=[pltpu.VMEM((Q, P), jnp.float32),
                        pltpu.VMEM((T_pad, P), jnp.float32)],
        compiler_params=pltpu.CompilerParams(
            dimension_semantics=("parallel", "arbitrary"),
            vmem_limit_bytes=vmem_limit),
        cost_estimate=pl.CostEstimate(flops=flops,
                                      transcendentals=transcendentals,
                                      bytes_accessed=bytes_accessed),
    )(idx, wgt, pred_flat, tgt_flat)


# ----------------------------------------------------------------------------
# Glue: exact linear sum assignment (brute force — small synthetic shapes only)
# ----------------------------------------------------------------------------
# TODO(synk): Hungarian assignment (scipy.linear_sum_assignment) has no Pallas
# equivalent; exact brute force on host is used here for small matrices.
def linear_sum_assignment_small(C):
    C = np.asarray(C, dtype=np.float64)
    n, m = C.shape
    if n > m:
        cols, rows = linear_sum_assignment_small(C.T)
        order = np.argsort(rows)
        return rows[order], cols[order]
    best_cols, best_cost = None, np.inf
    for cols in itertools.permutations(range(m), n):
        cost = C[np.arange(n), list(cols)].sum()
        if cost < best_cost:
            best_cost, best_cols = cost, cols
    return np.arange(n), np.array(best_cols)


def _round_up(x, m):
    return -(-x // m) * m


# ----------------------------------------------------------------------------
# HungarianMatcher (JAX/Pallas)
# ----------------------------------------------------------------------------
class HungarianMatcher:
    def __init__(self, cost_class=1.0, cost_mask=1.0, cost_dice=1.0, num_points=128):
        assert cost_class != 0 or cost_mask != 0 or cost_dice != 0, "all costs cant be 0"
        self.cost_class = cost_class
        self.cost_mask = cost_mask
        self.cost_dice = cost_dice
        self.num_points = num_points

    def forward(self, outputs, targets, key):
        pred_masks = outputs["pred_masks"]                       # [B, Q, H, W]
        B, num_queries, H, W = pred_masks.shape

        t_sizes = [int(t["masks"].shape[0]) for t in targets]
        # Pad T to a multiple of 128 -> lane-dense output stores on TPU.
        T_pad = _round_up(max(t_sizes), 128)

        # Device-side padding: no host numpy staging of the biggest tensor.
        tgt_padded = jnp.stack([
            jnp.pad(jnp.asarray(t["masks"], dtype=jnp.float32),
                    ((0, T_pad - t_sizes[b]), (0, 0), (0, 0)))
            for b, t in enumerate(targets)], axis=0)             # [B,T_pad,H,W]

        # One set of random points per batch element (matches reference).
        point_coords = jax.random.uniform(
            key, (B, self.num_points, 2), dtype=jnp.float32)

        # Single launch + single device->host transfer for all batches.
        C_all = _compute_cost_matrices(pred_masks, tgt_padded, point_coords,
                                       float(self.cost_mask), float(self.cost_dice))
        C_all = np.asarray(jax.block_until_ready(C_all))         # [B, Q, T_pad]

        indices = []
        for b in range(B):
            C = C_all[b, :, :t_sizes[b]].reshape(num_queries, -1)
            # Host-side NaN check (also catches any NaN propagated from pred_masks).
            assert not np.isnan(C).any(), "nan in cost matrix"
            indices.append(linear_sum_assignment_small(C))
        return [(np.asarray(i, dtype=np.int64), np.asarray(j, dtype=np.int64))
                for i, j in indices]


# ----------------------------------------------------------------------------
# Demo
# ----------------------------------------------------------------------------
if __name__ == "__main__":
    key = jax.random.PRNGKey(0)
    B, Q, H, W = 2, 8, 16, 16
    NUM_CLASSES = 4
    NUM_POINTS = 128

    k1, k2, k3, k4, k5 = jax.random.split(key, 5)
    outputs = {
        "pred_logits": jax.random.normal(k1, (B, Q, NUM_CLASSES), jnp.float32),
        "pred_masks": jax.random.normal(k2, (B, Q, H, W), jnp.float32),
    }

    # Deterministic synthetic targets: batch 0 has 3 objects, batch 1 has 5.
    def make_masks(k, n):
        return (jax.random.uniform(k, (n, H, W)) > 0.5).astype(jnp.float32)

    targets = [
        {"labels": jnp.array([0, 1, 2], dtype=jnp.int32), "masks": make_masks(k3, 3)},
        {"labels": jnp.array([1, 2, 3, 0, 1], dtype=jnp.int32), "masks": make_masks(k4, 5)},
    ]

    matcher = HungarianMatcher(cost_class=1.0, cost_mask=1.0, cost_dice=1.0,
                               num_points=NUM_POINTS)
    result = matcher.forward(outputs, targets, k5)

    for b, (i, j) in enumerate(result):
        assert len(i) == len(j) == min(Q, targets[b]["masks"].shape[0])

    print("KERNEL_OK")
</pallas_src>

<mosaic_0001>
module attributes {stable_mosaic.version = 11 : i64} {
  func.func @_matcher_cost_kernel(%arg0: i32, %arg1: i32, %arg2: memref<1x128x4xi32, #tpu.memory_space<vmem>>, %arg3: memref<1x128x4xf32, #tpu.memory_space<vmem>>, %arg4: memref<1x8x256xbf16, #tpu.memory_space<vmem>>, %arg5: memref<1x128x256xbf16, #tpu.memory_space<vmem>>, %arg6: memref<1x8x128xf32, #tpu.memory_space<vmem>>, %arg7: memref<8x128xf32, #tpu.memory_space<vmem>>, %arg8: memref<128x128xf32, #tpu.memory_space<vmem>>) attributes {dimension_semantics = [#tpu.dimension_semantics<parallel>, #tpu.dimension_semantics<arbitrary>], iteration_bounds = array<i64: 2, 1>, scalar_prefetch = 0 : i64, scratch_operands = 2 : i64, tpu.core_type = #tpu.core_type<tc>, window_params = [{transform_indices = @transform_0, window_bounds = array<i64: 1, 128, 4>}, {transform_indices = @transform_1, window_bounds = array<i64: 1, 128, 4>}, {transform_indices = @transform_2, window_bounds = array<i64: 1, 8, 256>}, {transform_indices = @transform_3, window_bounds = array<i64: 1, 128, 256>}, {transform_indices = @transform_4, window_bounds = array<i64: 1, 8, 128>}]} {
    %c0_i32 = arith.constant 0 : i32
    %0 = arith.cmpi eq, %arg1, %c0_i32 : i32
    %1 = arith.extui %0 : i1 to i32
    %c0_i32_0 = arith.constant 0 : i32
    %2 = arith.cmpi ne, %1, %c0_i32_0 : i32
    scf.if %2 {
      %cst_43 = arith.constant 0.000000e+00 : f32
      %68 = vector.broadcast %cst_43 : f32 to vector<8x128xf32>
      %c0_44 = arith.constant 0 : index
      %c0_45 = arith.constant 0 : index
      %69 = vector.load %arg7[%c0_44, %c0_45] : memref<8x128xf32, #tpu.memory_space<vmem>>, vector<8x128xf32>
      tpu.vector_store %arg7[%c0_44, %c0_45], %68 {strides = array<i32>} : memref<8x128xf32, #tpu.memory_space<vmem>>, vector<8x128xf32>,
      %cst_46 = arith.constant 0.000000e+00 : f32
      %70 = vector.broadcast %cst_46 : f32 to vector<128x128xf32>
      %c0_47 = arith.constant 0 : index
      %c0_48 = arith.constant 0 : index
      %71 = vector.load %arg8[%c0_47, %c0_48] : memref<128x128xf32, #tpu.memory_space<vmem>>, vector<128x128xf32>
      tpu.vector_store %arg8[%c0_47, %c0_48], %70 {strides = array<i32>} : memref<128x128xf32, #tpu.memory_space<vmem>>, vector<128x128xf32>,
    } else {
    }
    %c256_i32 = arith.constant 256 : i32
    %3 = arith.muli %arg1, %c256_i32 : i32
    %4 = tpu.iota {dimensions = array<i32: 1>} : vector<128x256xi32>
    %5 = vector.broadcast %3 : i32 to vector<128x256xi32>
    %6 = arith.addi %5, %4 : vector<128x256xi32>
    %cst = arith.constant 0.000000e+00 : f32
    %7 = vector.broadcast %cst : f32 to vector<128x256xf32>
    %c0 = arith.constant 0 : index
    %c0_1 = arith.constant 0 : index
    %c0_2 = arith.constant 0 : index
    %8 = vector.load %arg2[%c0, %c0_1, %c0_2] : memref<1x128x4xi32, #tpu.memory_space<vmem>>, vector<1x128x1xi32>
    %9 = vector.shape_cast %8 : vector<1x128x1xi32> to vector<128x1xi32>
    %10 = vector.broadcast %9 : vector<128x1xi32> to vector<128x256xi32>
    %11 = arith.cmpi eq, %6, %10 : vector<128x256xi32>
    %c0_3 = arith.constant 0 : index
    %c0_4 = arith.constant 0 : index
    %c0_5 = arith.constant 0 : index
    %12 = vector.load %arg3[%c0_3, %c0_4, %c0_5] : memref<1x128x4xf32, #tpu.memory_space<vmem>>, vector<1x128x1xf32>
    %13 = vector.shape_cast %12 : vector<1x128x1xf32> to vector<128x1xf32>
    %cst_6 = arith.constant 0.000000e+00 : f32
    %14 = vector.shape_cast %13 : vector<128x1xf32> to vector<128x1xf32>
    %15 = vector.broadcast %14 : vector<128x1xf32> to vector<128x256xf32>
    %16 = vector.broadcast %cst_6 : f32 to vector<128x256xf32>
    %17 = arith.select %11, %15, %16 : vector<128x256xi1>, vector<128x256xf32>
    %18 = arith.addf %7, %17 : vector<128x256xf32>
    %c0_7 = arith.constant 0 : index
    %c0_8 = arith.constant 0 : index
    %c1 = arith.constant 1 : index
    %19 = vector.load %arg2[%c0_7, %c0_8, %c1] : memref<1x128x4xi32, #tpu.memory_space<vmem>>, vector<1x128x1xi32>
    %20 = vector.shape_cast %19 : vector<1x128x1xi32> to vector<128x1xi32>
    %21 = vector.broadcast %20 : vector<128x1xi32> to vector<128x256xi32>
    %22 = arith.cmpi eq, %6, %21 : vector<128x256xi32>
    %c0_9 = arith.constant 0 : index
    %c0_10 = arith.constant 0 : index
    %c1_11 = arith.constant 1 : index
    %23 = vector.load %arg3[%c0_9, %c0_10, %c1_11] : memref<1x128x4xf32, #tpu.memory_space<vmem>>, vector<1x128x1xf32>
    %24 = vector.shape_cast %23 : vector<1x128x1xf32> to vector<128x1xf32>
    %cst_12 = arith.constant 0.000000e+00 : f32
    %25 = vector.shape_cast %24 : vector<128x1xf32> to vector<128x1xf32>
    %26 = vector.broadcast %25 : vector<128x1xf32> to vector<128x256xf32>
    %27 = vector.broadcast %cst_12 : f32 to vector<128x256xf32>
    %28 = arith.select %22, %26, %27 : vector<128x256xi1>, vector<128x256xf32>
    %29 = arith.addf %18, %28 : vector<128x256xf32>
    %c0_13 = arith.constant 0 : index
    %c0_14 = arith.constant 0 : index
    %c2 = arith.constant 2 : index
    %30 = vector.load %arg2[%c0_13, %c0_14, %c2] : memref<1x128x4xi32, #tpu.memory_space<vmem>>, vector<1x128x1xi32>
    %31 = vector.shape_cast %30 : vector<1x128x1xi32> to vector<128x1xi32>
    %32 = vector.broadcast %31 : vector<128x1xi32> to vector<128x256xi32>
    %33 = arith.cmpi eq, %6, %32 : vector<128x256xi32>
    %c0_15 = arith.constant 0 : index
    %c0_16 = arith.constant 0 : index
    %c2_17 = arith.constant 2 : index
    %34 = vector.load %arg3[%c0_15, %c0_16, %c2_17] : memref<1x128x4xf32, #tpu.memory_space<vmem>>, vector<1x128x1xf32>
    %35 = vector.shape_cast %34 : vector<1x128x1xf32> to vector<128x1xf32>
    %cst_18 = arith.constant 0.000000e+00 : f32
    %36 = vector.shape_cast %35 : vector<128x1xf32> to vector<128x1xf32>
    %37 = vector.broadcast %36 : vector<128x1xf32> to vector<128x256xf32>
    %38 = vector.broadcast %cst_18 : f32 to vector<128x256xf32>
    %39 = arith.select %33, %37, %38 : vector<128x256xi1>, vector<128x256xf32>
    %40 = arith.addf %29, %39 : vector<128x256xf32>
    %c0_19 = arith.constant 0 : index
    %c0_20 = arith.constant 0 : index
    %c3 = arith.constant 3 : index
    %41 = vector.load %arg2[%c0_19, %c0_20, %c3] : memref<1x128x4xi32, #tpu.memory_space<vmem>>, vector<1x128x1xi32>
    %42 = vector.shape_cast %41 : vector<1x128x1xi32> to vector<128x1xi32>
    %43 = vector.broadcast %42 : vector<128x1xi32> to vector<128x256xi32>
    %44 = arith.cmpi eq, %6, %43 : vector<128x256xi32>
    %c0_21 = arith.constant 0 : index
    %c0_22 = arith.constant 0 : index
    %c3_23 = arith.constant 3 : index
    %45 = vector.load %arg3[%c0_21, %c0_22, %c3_23] : memref<1x128x4xf32, #tpu.memory_space<vmem>>, vector<1x128x1xf32>
    %46 = vector.shape_cast %45 : vector<1x128x1xf32> to vector<128x1xf32>
    %cst_24 = arith.constant 0.000000e+00 : f32
    %47 = vector.shape_cast %46 : vector<128x1xf32> to vector<128x1xf32>
    %48 = vector.broadcast %47 : vector<128x1xf32> to vector<128x256xf32>
    %49 = vector.broadcast %cst_24 : f32 to vector<128x256xf32>
    %50 = arith.select %44, %48, %49 : vector<128x256xi1>, vector<128x256xf32>
    %51 = arith.addf %40, %50 : vector<128x256xf32>
    %52 = arith.truncf %51 : vector<128x256xf32> to vector<128x256xbf16>
    %c0_25 = arith.constant 0 : index
    %c0_26 = arith.constant 0 : index
    %53 = vector.load %arg7[%c0_25, %c0_26] : memref<8x128xf32, #tpu.memory_space<vmem>>, vector<8x128xf32>
    %c0_27 = arith.constant 0 : index
    %c0_28 = arith.constant 0 : index
    %c0_29 = arith.constant 0 : index
    %54 = vector.load %arg4[%c0_27, %c0_28, %c0_29] : memref<1x8x256xbf16, #tpu.memory_space<vmem>>, vector<1x8x256xbf16>
    %55 = vector.shape_cast %54 : vector<1x8x256xbf16> to vector<8x256xbf16>
    %cst_30 = arith.constant dense<0.000000e+00> : vector<8x128xf32>
    %56 = tpu.matmul %55, %52, %cst_30 {dimension_numbers = #tpu.dot_dimension_numbers<[1], [1], [0], [0], [0, 0, 1, 0], [], []>} : vector<8x256xbf16>, vector<128x256xbf16>, vector<8x128xf32> -> vector<8x128xf32>
    %57 = arith.addf %53, %56 : vector<8x128xf32>
    %c0_31 = arith.constant 0 : index
    %c0_32 = arith.constant 0 : index
    %58 = vector.load %arg7[%c0_31, %c0_32] : memref<8x128xf32, #tpu.memory_space<vmem>>, vector<8x128xf32>
    tpu.vector_store %arg7[%c0_31, %c0_32], %57 {strides = array<i32>} : memref<8x128xf32, #tpu.memory_space<vmem>>, vector<8x128xf32>,
    %c0_33 = arith.constant 0 : index
    %c0_34 = arith.constant 0 : index
    %59 = vector.load %arg8[%c0_33, %c0_34] : memref<128x128xf32, #tpu.memory_space<vmem>>, vector<128x128xf32>
    %c0_35 = arith.constant 0 : index
    %c0_36 = arith.constant 0 : index
    %c0_37 = arith.constant 0 : index
    %60 = vector.load %arg5[%c0_35, %c0_36, %c0_37] : memref<1x128x256xbf16, #tpu.memory_space<vmem>>, vector<1x128x256xbf16>
    %61 = vector.shape_cast %60 : vector<1x128x256xbf16> to vector<128x256xbf16>
    %cst_38 = arith.constant dense<0.000000e+00> : vector<128x128xf32>
    %62 = tpu.matmul %61, %52, %cst_38 {dimension_numbers = #tpu.dot_dimension_numbers<[1], [1], [0], [0], [0, 0, 1, 0], [], []>} : vector<128x256xbf16>, vector<128x256xbf16>, vector<128x128xf32> -> vector<128x128xf32>
    %63 = arith.addf %59, %62 : vector<128x128xf32>
    %c0_39 = arith.constant 0 : index
    %c0_40 = arith.constant 0 : index
    %64 = vector.load %arg8[%c0_39, %c0_40] : memref<128x128xf32, #tpu.memory_space<vmem>>, vector<128x128xf32>
    tpu.vector_store %arg8[%c0_39, %c0_40], %63 {strides = array<i32>} : memref<128x128xf32, #tpu.memory_space<vmem>>, vector<128x128xf32>,
    %c0_i32_41 = arith.constant 0 : i32
    %65 = arith.cmpi eq, %arg1, %c0_i32_41 : i32
    %66 = arith.extui %65 : i1 to i32
    %c0_i32_42 = arith.constant 0 : i32
    %67 = arith.cmpi ne, %66, %c0_i32_42 : i32
    scf.if %67 {
      %c0_43 = arith.constant 0 : index
      %c0_44 = arith.constant 0 : index
      %68 = vector.load %arg7[%c0_43, %c0_44] : memref<8x128xf32, #tpu.memory_space<vmem>>, vector<8x128xf32>
      %c0_45 = arith.constant 0 : index
      %c0_46 = arith.constant 0 : index
      %69 = vector.load %arg8[%c0_45, %c0_46] : memref<128x128xf32, #tpu.memory_space<vmem>>, vector<128x128xf32>
      %70 = math.absf %68 : vector<8x128xf32>
      %cst_47 = arith.constant 0.000000e+00 : f32
      %71 = vector.broadcast %cst_47 : f32 to vector<8x128xf32>
      %72 = arith.subf %71, %70 : vector<8x128xf32>
      %73 = math.exp %72 : vector<8x128xf32>
      %cst_48 = arith.constant 0.000000e+00 : f32
      %74 = vector.broadcast %cst_48 : f32 to vector<8x128xf32>
      %75 = arith.maximumf %68, %74 : vector<8x128xf32>
      %76 = math.log1p %73 : vector<8x128xf32>
      %77 = arith.addf %75, %76 : vector<8x128xf32>
      %cst_49 = arith.constant 1.000000e+00 : f32
      %78 = vector.broadcast %cst_49 : f32 to vector<8x128xf32>
      %79 = arith.addf %78, %73 : vector<8x128xf32>
      %80 = tpu.reciprocal %79 {approx = true} : vector<8x128xf32> -> vector<8x128xf32>
      %cst_50 = arith.constant 0.000000e+00 : f32
      %81 = vector.broadcast %cst_50 : f32 to vector<8x128xf32>
      %82 = arith.cmpf oge, %68, %81 : vector<8x128xf32>
      %83 = arith.mulf %73, %80 : vector<8x128xf32>
      %84 = arith.select %82, %80, %83 : vector<8x128xi1>, vector<8x128xf32>
      %cst_51 = arith.constant dense<0.000000e+00> : vector<8xf32>
      %85 = vector.multi_reduction <add>, %77, %cst_51 [1] : vector<8x128xf32> to vector<8xf32>
      %86 = vector.shape_cast %85 : vector<8xf32> to vector<8x1xf32>
      %cst_52 = arith.constant dense<0.000000e+00> : vector<8x128xf32>
      %87 = tpu.matmul %68, %69, %cst_52 {dimension_numbers = #tpu.dot_dimension_numbers<[1], [1], [0], [0], [0, 0, 1, 0], [], []>} : vector<8x128xf32>, vector<128x128xf32>, vector<8x128xf32> -> vector<8x128xf32>
      %88 = vector.broadcast %86 : vector<8x1xf32> to vector<8x128xf32>
      %89 = arith.subf %88, %87 : vector<8x128xf32>
      %cst_53 = arith.constant dense<0.000000e+00> : vector<8x128xf32>
      %90 = tpu.matmul %84, %69, %cst_53 {dimension_numbers = #tpu.dot_dimension_numbers<[1], [1], [0], [0], [0, 0, 1, 0], [], []>} : vector<8x128xf32>, vector<128x128xf32>, vector<8x128xf32> -> vector<8x128xf32>
      %cst_54 = arith.constant 2.000000e+00 : f32
      %91 = vector.broadcast %cst_54 : f32 to vector<8x128xf32>
      %92 = arith.mulf %91, %90 : vector<8x128xf32>
      %cst_55 = arith.constant 1.000000e+00 : f32
      %93 = vector.broadcast %cst_55 : f32 to vector<1x128xf32>
      %cst_56 = arith.constant dense<0.000000e+00> : vector<1x128xf32>
      %94 = tpu.matmul %93, %69, %cst_56 {dimension_numbers = #tpu.dot_dimension_numbers<[1], [1], [0], [0], [0, 0, 1, 0], [], []>} : vector<1x128xf32>, vector<128x128xf32>, vector<1x128xf32> -> vector<1x128xf32>
      %cst_57 = arith.constant dense<0.000000e+00> : vector<8xf32>
      %95 = vector.multi_reduction <add>, %84, %cst_57 [1] : vector<8x128xf32> to vector<8xf32>
      %96 = vector.shape_cast %95 : vector<8xf32> to vector<8x1xf32>
      %97 = vector.broadcast %96 : vector<8x1xf32> to vector<8x128xf32>
      %98 = vector.broadcast %94 : vector<1x128xf32> to vector<8x128xf32>
      %99 = arith.addf %97, %98 : vector<8x128xf32>
      %cst_58 = arith.constant 1.000000e+00 : f32
      %100 = vector.broadcast %cst_58 : f32 to vector<8x128xf32>
      %101 = arith.addf %92, %100 : vector<8x128xf32>
      %cst_59 = arith.constant 1.000000e+00 : f32
      %102 = vector.broadcast %cst_59 : f32 to vector<8x128xf32>
      %103 = arith.addf %99, %102 : vector<8x128xf32>
      %104 = tpu.reciprocal %103 {approx = true} : vector<8x128xf32> -> vector<8x128xf32>
      %105 = arith.mulf %101, %104 : vector<8x128xf32>
      %cst_60 = arith.constant 1.000000e+00 : f32
      %106 = vector.broadcast %cst_60 : f32 to vector<8x128xf32>
      %107 = arith.subf %106, %105 : vector<8x128xf32>
      %cst_61 = arith.constant 7.812500e-03 : f32
      %108 = vector.broadcast %cst_61 : f32 to vector<8x128xf32>
      %109 = arith.mulf %108, %89 : vector<8x128xf32>
      %cst_62 = arith.constant 1.000000e+00 : f32
      %110 = vector.broadcast %cst_62 : f32 to vector<8x128xf32>
      %111 = arith.mulf %110, %107 : vector<8x128xf32>
      %112 = arith.addf %109, %111 : vector<8x128xf32>
      %c0_63 = arith.constant 0 : index
      %c0_64 = arith.constant 0 : index
      %c0_65 = arith.constant 0 : index
      %113 = vector.load %arg6[%c0_63, %c0_64, %c0_65] : memref<1x8x128xf32, #tpu.memory_space<vmem>>, vector<1x8x128xf32>
      %114 = vector.shape_cast %113 : vector<1x8x128xf32> to vector<8x128xf32>
      %115 = vector.shape_cast %112 : vector<8x128xf32> to vector<1x8x128xf32>
      tpu.vector_store %arg6[%c0_63, %c0_64, %c0_65], %115 {strides = array<i32>} : memref<1x8x128xf32, #tpu.memory_space<vmem>>, vector<1x8x128xf32>,
    } else {
    }
    return
  }
  func.func @transform_0(%arg0: i32, %arg1: i32) -> (i32, i32, i32) {
    %c0_i32 = arith.constant 0 : i32
    %c0_i32_0 = arith.constant 0 : i32
    %c0_i32_1 = arith.constant 0 : i32
    return %arg0, %c0_i32, %c0_i32_0 : i32, i32, i32
  }
  func.func @transform_1(%arg0: i32, %arg1: i32) -> (i32, i32, i32) {
    %c0_i32 = arith.constant 0 : i32
    %c0_i32_0 = arith.constant 0 : i32
    %c0_i32_1 = arith.constant 0 : i32
    return %arg0, %c0_i32, %c0_i32_0 : i32, i32, i32
  }
  func.func @transform_2(%arg0: i32, %arg1: i32) -> (i32, i32, i32) {
    %c0_i32 = arith.constant 0 : i32
    %c0_i32_0 = arith.constant 0 : i32
    return %arg0, %c0_i32, %arg1 : i32, i32, i32
  }
  func.func @transform_3(%arg0: i32, %arg1: i32) -> (i32, i32, i32) {
    %c0_i32 = arith.constant 0 : i32
    %c0_i32_0 = arith.constant 0 : i32
    return %arg0, %c0_i32, %arg1 : i32, i32, i32
  }
  func.func @transform_4(%arg0: i32, %arg1: i32) -> (i32, i32, i32) {
    %c0_i32 = arith.constant 0 : i32
    %c0_i32_0 = arith.constant 0 : i32
    %c0_i32_1 = arith.constant 0 : i32
    return %arg0, %c0_i32, %c0_i32_0 : i32, i32, i32
  }
}

</mosaic_0001>

<bundles_post_ra>
// kernel: _compute_cost_matrices.1
= control target key start
LH: loop header
LB: loop body
LE: loop exit
PB: predicated region body
PF: predicated region fallthrough
CT: control target
= control target key end

     0   :  { %9 = vsyncpa [#allocation5], 0  ;;  %s3340_s0 = inlined_call_operand.vmem [shape: s32[2,128,4], index: 0, kind: input, shape index: {}]   ;;  %s3341_s1 = inlined_call_operand.vmem [shape: f32[2,128,4], index: 1, kind: input, shape index: {}]   ;;  %s3342_s2 = inlined_call_operand.vmem [shape: bf16[2,8,256], index: 2, kind: input, shape index: {}]   ;;  %s3343_s3 = inlined_call_operand.vmem [shape: bf16[2,128,256], index: 3, kind: input, shape index: {}]   ;;  %s3344_s4 = inlined_call_operand.hbm [shape: f32[2,8,128], index: 4, kind: output, shape index: {}]  }
   0x1   :  { %11 = vsyncpa [#allocation5 + $0x1], 0  ;;  %s2445_s15 = smov 0   ;;  %s2447_s16 = smov 0  }
   0x2   :  { %s2449_s17 = smov 0   ;;  %s2451_s18 = smov 0  }
   0x3   :  { %s2453_s19 = smov 0   ;;  %s2455_s20 = smov 0  }
   0x4 LB: > { %s1915_s21 = sadd.s32 4294967295, %s2409_s20   ;;  %s1916_s22 = sadd.s32 4294967294, %s2409_s20   ;;  %s2409_s20 = sphi %s2455_s20, %s17_s20   ;;  %s2405_s19 = sphi %s2453_s19, %s3408_s19   ;;  %s2401_s18 = sphi %s2451_s18, %s3407_s18   ;;  %s2397_s17 = sphi %s2449_s17, %s3406_s17   ;;  %s2393_s16 = sphi %s2447_s16, %s3405_s16   ;;  %s2389_s15 = sphi %s2445_s15, %s3404_s15  }
   0x5   : > { %s29_s23 = sadd.s32 1, %s2405_s19  ;;  %s144_s24 = sadd.s32 1, %s2397_s17 }
   0x6   : > { %p31_p0 = scmp.ge.s32.totalorder %s29_s23, 2  ;;  %p154_p1 = scmp.ne.s32.totalorder %s2397_s17, %s2393_s16 }
   0x7   : > { %p155_p2 = scmp.eq.s32.totalorder %s1915_s21, 1  ;;  %p160_p3 = scmp.ne.s32.totalorder %s2393_s16, %s2389_s15 }
   0x8   : > { %s3410_s23 = smov (%p31_p0, %s29_s23), 0  ;;  %p161_p5 = scmp.eq.s32.totalorder %s1916_s22, 1 }
   0x9   : > { %p2485_p4 = por %p155_p2, %p154_p1  ;;  %s141_s26 = ssub.s32 %s2405_s19, %s3410_s23 }
   0xa   : > { %p1919_p6 = scmp.ge.s32.totalorder %s2409_s20, 1  ;;  %p142_p7 = scmp.eq.s32.totalorder %s141_s26, 0 }
   0xb   : > { %p2492_p8 = por %p161_p5, %p160_p3  ;;  %p221_p9 = scmp.lt.s32.totalorder %s2409_s20, 3 }
   0xc   : > { %s2498_s28 = scalar_select %p142_p7, %s2397_s17, %s144_s24  }
   0xd   : > { %p222_p10 = pnand %p1919_p6, %p221_p9 }
   0xf   : > { %225 = sbr.rel (%p222_p10) target bundleno = 1121 (0x461), region = 36 }
  0x16   : > { %p270_p11 = scmp.lt.s32.totalorder %s2401_s18, 1  ;;  %v3350_v0 = vmov 1   ;;  %v3356_v1 = vmov 0   ;;  %v3348_v9 = vmov 2   ;;  %v3346_v13 = vmov 3   ;;  %s267_s26 = sand.u32 1, %s2393_s16  }
  0x17   : > { %2247 = vset.pattern.permute.xlu1 %v3350_v0  ;;  %2246 = vset.pattern.permute.xlu0 %v3356_v1  ;;  %v3345_v58 = vlaneseq }
  0x18   : > { %s2504_s29 = scalar_select %p270_p11, %s2401_s18, 1 }
  0x19   : > { %v2739_v62 = vand.u32 127, %v3345_v58 }
  0x1a   : > { %s2507_s30 = sshll.u32 %s2504_s29, 7  ;;  %s1953_s14 = sshll.u32 %s2504_s29, 3 }
  0x1b   : > { %s2513_s7 = scalar_lea.vmem %s3340_s0, %s2507_s30  ;;  %s2527_s10 = scalar_lea.vmem %s3341_s1, %s2507_s30 }
  0x1c   : > { %v2516_v2 = vld [vmem:[%s2513_s7] sm:$0xff]  ;;  %v2521_v3 = vld [vmem:[%s2513_s7 + $0x8] sm:$0xff]  ;;  %v2538_v6 = vld [vmem:[%s2513_s7 + $0x18] sm:$0xff]  ;;  %s3131_s13 = scalar_lea.vmem %s3343_s3, %s2507_s30  ;;  %s288_s24 = scalar_lea.vmem %s3342_s2, %s1953_s14 }
  0x1d   : > { %586 = vperm.xlu1 %2247, %v2516_v2   ;;  %346 = vperm.xlu0 %2246, %v2516_v2   ;;  %v425_v4 = vld [vmem:[%s2527_s10] sm:$0xff]  ;;  %v2533_v5 = vld [vmem:[%s2527_s10 + $0x8] sm:$0xff]  ;;  %v427_v7 = vld [vmem:[%s2527_s10 + $0x10] sm:$0xff]  ;;  %s1920_s29 = sshll.u32 %s267_s26, 3  ;;  %s1948_s30 = sshll.u32 %s2401_s18, 7 }
  0x1e   : > { %v2545_v8 = vld [vmem:[%s2513_s7 + $0x28] sm:$0xff]  ;;  %v2551_v10 = vld [vmem:[%s2527_s10 + $0x20] sm:$0xff]  ;;  %v2555_v11 = vld [vmem:[%s2513_s7 + $0x38] sm:$0xff]  ;;  %s269_s5 = scalar_lea.vmem [#allocation4], %s1920_s29  ;;  %s3293_s9 = scalar_lea.hbm %s3344_s4, %s1948_s30 }
  0x1f   : > { %v2560_v12 = vld [vmem:[%s2527_s10 + $0x30] sm:$0xff]  ;;  %v2566_v14 = vld [vmem:[%s2513_s7 + $0x48] sm:$0xff]  ;;  %v2570_v15 = vld [vmem:[%s2527_s10 + $0x40] sm:$0xff]  ;;  %s1800_s6 = sshll.u32 %s269_s5, 4  ;;  %s2419_s18 = smov [#allocation4]   ;;  %s3295_s6 = int_to_ptr.vmem [resolvable:$true] %s1800_s6 }
  0x20   : > { %v2573_v16 = vld [vmem:[%s2513_s7 + $0x10] sm:$0xff]  ;;  %v2579_v17 = vld [vmem:[%s2513_s7 + $0x58] sm:$0xff]  ;;  %v2589_v19 = vld [vmem:[%s2513_s7 + $0x68] sm:$0xff]  ;;  %s2331_s11 = scalar_lea.vmem %s3295_s6, 128  ;;  %s2335_s12 = sshll.u32 %s2419_s18, 4  ;;  %s2336_s12 = int_to_ptr.vmem [resolvable:$false] %s2335_s12 }
  0x21   : > { %589 = vperm.xlu1 %2247, %v2521_v3   ;;  %349 = vperm.xlu0 %2246, %v2521_v3   ;;  %v2584_v18 = vld [vmem:[%s2527_s10 + $0x50] sm:$0xff]  ;;  %v2594_v20 = vld [vmem:[%s2527_s10 + $0x18] sm:$0xff]  ;;  %v2597_v21 = vld [vmem:[%s2527_s10 + $0x60] sm:$0xff]  ;;  %p2332_p12 = scmp.ne.s32.totalorder %s3295_s6, %s2331_s11  ;;  %p2338_p1 = scmp.lt.s32.totalorder %s3295_s6, %s2336_s12 }
  0x22   : > { %v2603_v22 = vld [vmem:[%s2513_s7 + $0x78] sm:$0xff]  ;;  %v2609_v23 = vld [vmem:[%s2527_s10 + $0x70] sm:$0xff]  ;;  %v333_v24 = vld [vmem:[%s2513_s7 + $0x20] sm:$0xff] }
  0x23   : > { %3371 = vst [vmem:[#allocation7_spill] sm:$0xff] %v2609_v23  ;;  %v430_v25 = vld [vmem:[%s2527_s10 + $0x28] sm:$0xff]  ;;  %v335_v28 = vld [vmem:[%s2513_s7 + $0x30] sm:$0xff]  ;;  %v432_v36 = vld [vmem:[%s2527_s10 + $0x38] sm:$0xff]  ;;  %p2333_p13 = pnand %p2332_p12, %p2485_p4 }
  0x24   : > { %v2698_v47 = vld [vmem:[%s2513_s7 + $0x40] sm:$0xff]  ;;  %v2706_v50 = vld [vmem:[%s2527_s10 + $0x48] sm:$0xff]  ;;  %v2713_v53 = vld [vmem:[%s2513_s7 + $0x50] sm:$0xff] }
  0x25   : > { %2248 = vset.pattern.permute.xlu1 %v3356_v1  ;;  %443 = vperm.xlu0 %2246, %v425_v4   ;;  %v2722_v56 = vld [vmem:[%s2527_s10 + $0x58] sm:$0xff]  ;;  %v2731_v60 = vld [vmem:[%s2513_s7 + $0x60] sm:$0xff]  ;;  %v2742_v63 = vld [vmem:[%s2527_s10 + $0x68] sm:$0xff]  ;;  %p2334_p0 = pneg %p2333_p13 }
  0x26   : > { %448 = vperm.xlu1 %2248, %v2533_v5  }
  0x29   : > { %355 = vperm.xlu0 %2246, %v2538_v6  }
  0x2a   : > { %2249 = vset.pattern.permute.xlu1 %v3350_v0 }
  0x2b   : > { %670 = vperm.xlu1 %2249, %v2533_v5  }
  0x2d   : > { %453 = vperm.xlu0 %2246, %v427_v7  }
  0x2f   : > { %2250 = vset.pattern.permute.xlu1 %v3348_v9 }
  0x30   : > { %794 = vperm.xlu1 %2250, %v2516_v2  }
  0x31   : > { %361 = vperm.xlu0 %2246, %v2545_v8  }
  0x34   : > { %874 = vperm.xlu1 %2250, %v425_v4  }
  0x35   : > { %463 = vperm.xlu0 %2246, %v2551_v10  }
  0x38   : > { %878 = vperm.xlu1 %2250, %v2533_v5  }
  0x39   : > { %367 = vperm.xlu0 %2246, %v2555_v11  }
  0x3c   : > { %2251 = vset.pattern.permute.xlu1 %v3346_v13 }
  0x3d   : > { %1005 = vperm.xlu1 %2251, %v2521_v3   ;;  %473 = vperm.xlu0 %2246, %v2560_v12  }
  0x41   : > { %1082 = vperm.xlu1 %2251, %v425_v4   ;;  %373 = vperm.xlu0 %2246, %v2566_v14  }
  0x45   : > { %2252 = vset.pattern.permute.xlu1 %v3356_v1  ;;  %483 = vperm.xlu0 %2246, %v2570_v15  }
  0x46   : > { %352 = vperm.xlu1 %2252, %v2573_v16  }
  0x49   : > { %379 = vperm.xlu0 %2246, %v2579_v17  }
  0x4a   : > { %2253 = vset.pattern.permute.xlu1 %v3350_v0 }
  0x4b   : > { %592 = vperm.xlu1 %2253, %v2573_v16  }
  0x4d   : > { %493 = vperm.xlu0 %2246, %v2584_v18  }
  0x4f   : > { %595 = vperm.xlu1 %2253, %v2538_v6  }
  0x51   : > { %385 = vperm.xlu0 %2246, %v2589_v19  }
  0x53   : > { %2254 = vset.pattern.permute.xlu1 %v3356_v1 }
  0x54   : > { %458 = vperm.xlu1 %2254, %v2594_v20  }
  0x55   : > { %503 = vperm.xlu0 %2246, %v2597_v21  }
  0x58   : > { %2255 = vset.pattern.permute.xlu1 %v3350_v0 }
  0x59   : > { %678 = vperm.xlu1 %2255, %v2594_v20   ;;  %391 = vperm.xlu0 %2246, %v2603_v22  }
  0x5d   : > { %2256 = vset.pattern.permute.xlu1 %v3348_v9  ;;  %513 = vperm.xlu0 %2246, %v2609_v23  }
  0x5e   : > { %800 = vperm.xlu1 %2256, %v2573_v16  }
  0x61   : > { %2290 = vset.pattern.permute.xlu0 %v3350_v0 }
  0x62   : > { %882 = vperm.xlu1 %2256, %v427_v7   ;;  %666 = vperm.xlu0 %2290, %v425_v4   ;;  %v2751_v4 = vld [vmem:[%s2513_s7 + $0x70] sm:$0xff] }
  0x66   : > { %886 = vperm.xlu1 %2256, %v2594_v20   ;;  %674 = vperm.xlu0 %2290, %v427_v7  }
  0x6a   : > { %2257 = vset.pattern.permute.xlu1 %v3346_v13  ;;  %682 = vperm.xlu0 %2290, %v2551_v10  }
  0x6b   : > { %1011 = vperm.xlu1 %2257, %v2538_v6  }
  0x6e   : > { %690 = vperm.xlu0 %2290, %v2560_v12  }
  0x6f   : > { %1090 = vperm.xlu1 %2257, %v427_v7  }
  0x72   : > { %698 = vperm.xlu0 %2290, %v2570_v15  }
  0x73   : > { %2258 = vset.pattern.permute.xlu1 %v3356_v1 }
  0x74   : > { %358 = vperm.xlu1 %2258, %v333_v24  }
  0x76   : > { %706 = vperm.xlu0 %2290, %v2584_v18  }
  0x78   : > { %2259 = vset.pattern.permute.xlu1 %v3350_v0 }
  0x79   : > { %598 = vperm.xlu1 %2259, %v333_v24  }
  0x7a   : > { %714 = vperm.xlu0 %2290, %v2597_v21  }
  0x7d   : > { %601 = vperm.xlu1 %2259, %v2545_v8  }
  0x7e   : > { %722 = vperm.xlu0 %2290, %v2609_v23  }
  0x81   : > { %2260 = vset.pattern.permute.xlu1 %v3356_v1 }
  0x82   : > { %468 = vperm.xlu1 %2260, %v430_v25   ;;  %2292 = vset.pattern.permute.xlu0 %v3348_v9 }
  0x83   : > { %797 = vperm.xlu0 %2292, %v2521_v3  }
  0x86   : > { %2261 = vset.pattern.permute.xlu1 %v3350_v0 }
  0x87   : > { %686 = vperm.xlu1 %2261, %v430_v25   ;;  %803 = vperm.xlu0 %2292, %v2538_v6  }
  0x8b   : > { %2262 = vset.pattern.permute.xlu1 %v3348_v9  ;;  %809 = vperm.xlu0 %2292, %v2545_v8  }
  0x8c   : > { %806 = vperm.xlu1 %2262, %v333_v24  }
  0x8f   : > { %815 = vperm.xlu0 %2292, %v2555_v11  }
  0x90   : > { %890 = vperm.xlu1 %2262, %v2551_v10  }
  0x93   : > { %821 = vperm.xlu0 %2292, %v2566_v14  }
  0x94   : > { %894 = vperm.xlu1 %2262, %v430_v25  }
  0x97   : > { %827 = vperm.xlu0 %2292, %v2579_v17  }
  0x98   : > { %2263 = vset.pattern.permute.xlu1 %v3346_v13 }
  0x99   : > { %1017 = vperm.xlu1 %2263, %v2545_v8   ;;  %v2767_v8 = vld [vmem:[%s2527_s10 + $0x78] sm:$0xff]  ;;  %s1787_s10 = scalar_lea.sflag [#allocation5], %s267_s26 }
  0x9b   : > { %833 = vperm.xlu0 %2292, %v2589_v19  }
  0x9c   : > { %v2643_v26 = vpop.permute.xlu1 %586  ;;  %v2645_v27 = vpop.permute.xlu0 %346 }
  0x9d   : > { %1098 = vperm.xlu1 %2263, %v2551_v10   ;;  %vm393_vm0 = vcmp.eq.s32.totalorder %v2739_v62, %v2645_v27  ;;  %vm633_vm2 = vcmp.eq.s32.totalorder %v2739_v62, %v2643_v26 }
  0x9f   : > { %839 = vperm.xlu0 %2292, %v2603_v22  }
  0xa0   : > { %v2650_v29 = vpop.permute.xlu1 %589  ;;  %v2652_v30 = vpop.permute.xlu0 %349 }
  0xa1   : > { %2264 = vset.pattern.permute.xlu1 %v3356_v1  ;;  %vm395_vm12 = vcmp.eq.s32.totalorder %v2739_v62, %v2652_v30  ;;  %vm635_vm14 = vcmp.eq.s32.totalorder %v2739_v62, %v2650_v29 }
  0xa2   : > { %364 = vperm.xlu1 %2264, %v335_v28  }
  0xa3   : > { %2295 = vset.pattern.permute.xlu0 %v3346_v13 }
  0xa4   : > { %1002 = vperm.xlu0 %2295, %v2516_v2   ;;  %v2657_v31 = vpop.permute.xlu0 %443 }
  0xa5   : > { %v2659_v32 = vpop.permute.xlu1 %448  ;;  %v521_v10 = vsel %vm393_vm0, %v2657_v31, 0.0 }
  0xa6   : > { %2265 = vset.pattern.permute.xlu1 %v3350_v0 }
  0xa7   : > { %604 = vperm.xlu1 %2265, %v335_v28  }
  0xa8   : > { %1086 = vperm.xlu0 %2295, %v2533_v5   ;;  %v2663_v33 = vpop.permute.xlu0 %355  ;;  %v2754_v5 = vadd.s32 128, %v2739_v62 }
  0xa9   : > { %vm399_vm0 = vcmp.eq.s32.totalorder %v2739_v62, %v2663_v33 }
  0xaa   : > { %v2665_v34 = vpop.permute.xlu1 %670  ;;  %vm394_vm1 = vcmp.eq.s32.totalorder %v2754_v5, %v2645_v27  ;;  %vm634_vm3 = vcmp.eq.s32.totalorder %v2754_v5, %v2643_v26  ;;  %vm396_vm13 = vcmp.eq.s32.totalorder %v2754_v5, %v2652_v30  ;;  %vm636_vm15 = vcmp.eq.s32.totalorder %v2754_v5, %v2650_v29 }
  0xab   : > { %607 = vperm.xlu1 %2265, %v2555_v11  }
  0xac   : > { %1008 = vperm.xlu0 %2295, %v2573_v16   ;;  %v2669_v35 = vpop.permute.xlu0 %453 }
  0xaf   : > { %2266 = vset.pattern.permute.xlu1 %v3356_v1  ;;  %v2673_v37 = vpop.permute.xlu1 %794 }
  0xb0   : > { %478 = vperm.xlu1 %2266, %v432_v36   ;;  %1094 = vperm.xlu0 %2295, %v2594_v20   ;;  %v2676_v38 = vpop.permute.xlu0 %361 }
  0xb3   : > { %v2678_v39 = vpop.permute.xlu1 %874 }
  0xb4   : > { %2267 = vset.pattern.permute.xlu1 %v3350_v0  ;;  %1014 = vperm.xlu0 %2295, %v333_v24   ;;  %v2681_v40 = vpop.permute.xlu0 %463 }
  0xb5   : > { %694 = vperm.xlu1 %2267, %v432_v36  }
  0xb7   : > { %v2683_v41 = vpop.permute.xlu1 %878 }
  0xb8   : > { %1102 = vperm.xlu0 %2295, %v430_v25   ;;  %v2685_v42 = vpop.permute.xlu0 %367 }
  0xb9   : > { %2268 = vset.pattern.permute.xlu1 %v3348_v9 }
  0xba   : > { %812 = vperm.xlu1 %2268, %v335_v28  }
  0xbc   : > { %v2688_v43 = vpop.permute.xlu1 %1005  ;;  %v2690_v44 = vpop.permute.xlu0 %473  ;;  %1020 = vperm.xlu0 %2295, %v335_v28  }
  0xbe   : > { %898 = vperm.xlu1 %2268, %v2560_v12  }
  0xc0   : > { %v2693_v45 = vpop.permute.xlu1 %1082  ;;  %v2695_v46 = vpop.permute.xlu0 %373  ;;  %1110 = vperm.xlu0 %2295, %v432_v36  }
  0xc2   : > { %902 = vperm.xlu1 %2268, %v432_v36  }
  0xc4   : > { %v2700_v48 = vpop.permute.xlu0 %483  ;;  %1026 = vperm.xlu0 %2295, %v2698_v47  }
  0xc5   : > { %3372 = vst [vmem:[#allocation8_spill] sm:$0xff] %v2700_v48  ;;  %v353_v49 = vpop.permute.xlu1 %352 }
  0xc6   : > { %2269 = vset.pattern.permute.xlu1 %v3346_v13  ;;  %vm397_vm4 = vcmp.eq.s32.totalorder %v2739_v62, %v353_v49  ;;  %vm398_vm5 = vcmp.eq.s32.totalorder %v2754_v5, %v353_v49 }
  0xc7   : > { %1023 = vperm.xlu1 %2269, %v2555_v11   ;;  %v522_v11 = vsel %vm394_vm1, %v2657_v31, 0.0  ;;  %v525_v31 = vsel %vm397_vm4, %v2669_v35, 0.0  ;;  %v526_v36 = vsel %vm398_vm5, %v2669_v35, 0.0  ;;  %vm400_vm1 = vcmp.eq.s32.totalorder %v2754_v5, %v2663_v33 }
  0xc8   : > { %v2708_v51 = vpop.permute.xlu0 %379  ;;  %1118 = vperm.xlu0 %2295, %v2706_v50  }
  0xc9   : > { %3373 = vst [vmem:[#allocation9_spill] sm:$0xff] %v2708_v51  ;;  %v524_v51 = vsel %vm396_vm13, %v2659_v32, 0.0 }
  0xca   : > { %v593_v52 = vpop.permute.xlu1 %592 }
  0xcb   : > { %1106 = vperm.xlu1 %2269, %v2560_v12   ;;  %vm637_vm6 = vcmp.eq.s32.totalorder %v2739_v62, %v593_v52  ;;  %vm638_vm7 = vcmp.eq.s32.totalorder %v2754_v5, %v593_v52 }
  0xcc   : > { %v2715_v54 = vpop.permute.xlu0 %493  ;;  %1032 = vperm.xlu0 %2295, %v2713_v53  }
  0xcd   : > { %3374 = vst [vmem:[#allocation10_spill] sm:$0xff] %v2715_v54 }
  0xce   : > { %v2718_v55 = vpop.permute.xlu1 %595 }
  0xcf   : > { %2270 = vset.pattern.permute.xlu1 %v3356_v1 }
  0xd0   : > { %370 = vperm.xlu1 %2270, %v2698_v47   ;;  %v2725_v57 = vpop.permute.xlu0 %385  ;;  %1126 = vperm.xlu0 %2295, %v2722_v56  }
  0xd1   : > { %3375 = vst [vmem:[#allocation11_spill] sm:$0xff] %v2725_v57 }
  0xd3   : > { %v2728_v59 = vpop.permute.xlu1 %458 }
  0xd4   : > { %2271 = vset.pattern.permute.xlu1 %v3350_v0  ;;  %v2734_v61 = vpop.permute.xlu0 %503  ;;  %1038 = vperm.xlu0 %2295, %v2731_v60  }
  0xd5   : > { %3376 = vst [vmem:[#allocation12_spill] sm:$0xff] %v2734_v61  ;;  %610 = vperm.xlu1 %2271, %v2698_v47   ;;  %v3383_v61 = vmov 2  }
  0xd8   : > { %v2744_v2 = vpop.permute.xlu1 %678  ;;  %v2746_v3 = vpop.permute.xlu0 %391  ;;  %1134 = vperm.xlu0 %2295, %v2742_v63  }
  0xd9   : > { %3377 = vst [vmem:[#allocation13_spill] sm:$0xff] %v2746_v3  ;;  %613 = vperm.xlu1 %2271, %v2566_v14  }
  0xdc   : > { %v2756_v6 = vpop.permute.xlu0 %513  ;;  %1044 = vperm.xlu0 %2295, %v2751_v4  }
  0xdd   : > { %3378 = vst [vmem:[#allocation14_spill] sm:$0xff] %v2756_v6  ;;  %2272 = vset.pattern.permute.xlu1 %v3356_v1  ;;  %v2764_v7 = vpop.permute.xlu1 %800 }
  0xde   : > { %488 = vperm.xlu1 %2272, %v2706_v50   ;;  %vm845_vm13 = vcmp.eq.s32.totalorder %v2739_v62, %v2764_v7 }
  0xe0   : > { %1142 = vperm.xlu0 %2295, %v2767_v8  }
  0xe1   : > { %v2773_v12 = vpop.permute.xlu1 %882  ;;  %v667_v16 = vpop.permute.xlu0 %666 }
  0xe2   : > { %v729_v20 = vsel %vm633_vm2, %v667_v16, 0.0  ;;  %v730_v24 = vsel %vm634_vm3, %v667_v16, 0.0  ;;  %2273 = vset.pattern.permute.xlu1 %v3350_v0  ;;  %vm841_vm2 = vcmp.eq.s32.totalorder %v2739_v62, %v2673_v37  ;;  %vm842_vm3 = vcmp.eq.s32.totalorder %v2754_v5, %v2673_v37 }
  0xe3   : > { %v2782_v25 = vadd.f32 %v729_v20, %v521_v10  ;;  %v2784_v27 = vadd.f32 %v730_v24, %v522_v11  ;;  %702 = vperm.xlu1 %2273, %v2706_v50  }
  0xe5   : > { %v2787_v28 = vpop.permute.xlu1 %886  ;;  %v675_v26 = vpop.permute.xlu0 %674 }
  0xe6   : > { %v733_v16 = vsel %vm637_vm6, %v675_v26, 0.0  ;;  %v734_v58 = vsel %vm638_vm7, %v675_v26, 0.0  ;;  %vm403_vm6 = vcmp.eq.s32.totalorder %v2739_v62, %v2676_v38  ;;  %vm639_vm7 = vcmp.eq.s32.totalorder %v2739_v62, %v2718_v55 }
  0xe7   : > { %v2793_v49 = vadd.f32 %v733_v16, %v525_v31  ;;  %v2795_v10 = vadd.f32 %v734_v58, %v526_v36  ;;  %2274 = vset.pattern.permute.xlu1 %v3348_v9 }
  0xe8   : > { %818 = vperm.xlu1 %2274, %v2698_v47  }
  0xe9   : > { %v683_v11 = vpop.permute.xlu0 %682 }
  0xea   : > { %v2799_v20 = vpop.permute.xlu1 %1011 }
  0xec   : > { %906 = vperm.xlu1 %2274, %v2570_v15  }
  0xed   : > { %v2802_v52 = vpop.permute.xlu0 %690 }
  0xee   : > { %v2804_v24 = vpop.permute.xlu1 %1090 }
  0xf0   : > { %910 = vperm.xlu1 %2274, %v2706_v50  }
  0xf1   : > { %v2807_v35 = vpop.permute.xlu0 %698 }
  0xf3   : > { %v359_v26 = vpop.permute.xlu1 %358 }
  0xf4   : > { %2275 = vset.pattern.permute.xlu1 %v3346_v13  ;;  %vm401_vm8 = vcmp.eq.s32.totalorder %v2739_v62, %v359_v26  ;;  %vm402_vm9 = vcmp.eq.s32.totalorder %v2754_v5, %v359_v26 }
  0xf5   : > { %1029 = vperm.xlu1 %2275, %v2566_v14   ;;  %v2811_v58 = vpop.permute.xlu0 %706  ;;  %v529_v31 = vsel %vm401_vm8, %v2681_v40, 0.0  ;;  %v530_v36 = vsel %vm402_vm9, %v2681_v40, 0.0  ;;  %vm640_vm8 = vcmp.eq.s32.totalorder %v2754_v5, %v2718_v55  ;;  %vm1051_vm9 = vcmp.eq.s32.totalorder %v2739_v62, %v2688_v43 }
  0xf6   : > { %3379 = vst [vmem:[#allocation15_spill] sm:$0xff] %v2811_v58  ;;  %v732_v58 = vsel %vm636_vm15, %v2665_v34, 0.0  ;;  %v735_v55 = vsel %vm639_vm7, %v2744_v2, 0.0  ;;  %vm404_vm15 = vcmp.eq.s32.totalorder %v2754_v5, %v2676_v38  ;;  %vm1056_vm7 = vcmp.eq.s32.totalorder %v2754_v5, %v2799_v20 }
  0xf8   : > { %v599_v47 = vpop.permute.xlu1 %598 }
  0xf9   : > { %vm641_vm10 = vcmp.eq.s32.totalorder %v2739_v62, %v599_v47  ;;  %vm642_vm11 = vcmp.eq.s32.totalorder %v2754_v5, %v599_v47  ;;  %1114 = vperm.xlu1 %2275, %v2570_v15   ;;  %v2818_v50 = vpop.permute.xlu0 %714  ;;  %v3382_v47 = vmov 1  }
  0xfa   : > { %3380 = vst [vmem:[#allocation16_spill] sm:$0xff] %v2818_v50  ;;  %v737_v14 = vsel %vm641_vm10, %v683_v11, 0.0  ;;  %v738_v16 = vsel %vm642_vm11, %v683_v11, 0.0  ;;  %vm1052_vm10 = vcmp.eq.s32.totalorder %v2754_v5, %v2688_v43 }
  0xfb   : > { %v2822_v13 = vadd.f32 %v737_v14, %v529_v31  ;;  %v2824_v9 = vadd.f32 %v738_v16, %v530_v36 }
  0xfc   : > { %v2826_v26 = vpop.permute.xlu1 %601 }
  0xfd   : > { %2276 = vset.pattern.permute.xlu1 %v3356_v1  ;;  %v2829_v0 = vpop.permute.xlu0 %722 }
  0xfe   : > { %3381 = vst [vmem:[#allocation17_spill] sm:$0xff] %v2829_v0  ;;  %376 = vperm.xlu1 %2276, %v2713_v53  }
 0x101   : > { %v2832_v15 = vpop.permute.xlu1 %468 }
 0x102   : > { %2277 = vset.pattern.permute.xlu1 %v3382_v47  ;;  %v798_v6 = vpop.permute.xlu0 %797 }
 0x103   : > { %616 = vperm.xlu1 %2277, %v2713_v53   ;;  %vm843_vm4 = vcmp.eq.s32.totalorder %v2739_v62, %v798_v6  ;;  %vm844_vm5 = vcmp.eq.s32.totalorder %v2754_v5, %v798_v6 }
 0x106   : > { %v2836_v40 = vpop.permute.xlu1 %686  ;;  %v2838_v11 = vpop.permute.xlu0 %803 }
 0x107   : > { %619 = vperm.xlu1 %2277, %v2579_v17  }
 0x10a   : > { %v2841_v31 = vpop.permute.xlu0 %809 }
 0x10b   : > { %2278 = vset.pattern.permute.xlu1 %v3356_v1  ;;  %v2844_v36 = vpop.permute.xlu1 %806 }
 0x10c   : > { %498 = vperm.xlu1 %2278, %v2722_v56  }
 0x10e   : > { %v2847_v14 = vpop.permute.xlu0 %815 }
 0x10f   : > { %v2849_v16 = vpop.permute.xlu1 %890 }
 0x110   : > { %2279 = vset.pattern.permute.xlu1 %v3382_v47 }
 0x111   : > { %710 = vperm.xlu1 %2279, %v2722_v56  }
 0x112   : > { %v2853_v0 = vpop.permute.xlu0 %821 }
 0x113   : > { %v2855_v3 = vpop.permute.xlu1 %894 }
 0x115   : > { %2280 = vset.pattern.permute.xlu1 %v3383_v61 }
 0x116   : > { %824 = vperm.xlu1 %2280, %v2713_v53   ;;  %v2859_v1 = vpop.permute.xlu0 %827 }
 0x117   : > { %3384 = vst [vmem:[#allocation18_spill] sm:$0xff] %v2859_v1  ;;  %v523_v1 = vsel %vm395_vm12, %v2659_v32, 0.0  ;;  %v764_v32 = vadd.f32 %v732_v58, %v524_v51  ;;  %v528_v51 = vsel %vm400_vm1, %v2728_v59, 0.0  ;;  %vm848_vm1 = vcmp.eq.s32.totalorder %v2754_v5, %v2838_v11 }
 0x118   : > { %v2861_v50 = vpop.permute.xlu1 %1017 }
 0x11a   : > { %914 = vperm.xlu1 %2280, %v2584_v18   ;;  %v2864_v57 = vpop.permute.xlu0 %833 }
 0x11b   : > { %3385 = vst [vmem:[#allocation19_spill] sm:$0xff] %v2864_v57  ;;  %v731_v57 = vsel %vm635_vm14, %v2665_v34, 0.0  ;;  %v937_v34 = vsel %vm841_vm2, %v2678_v39, 0.0  ;;  %vm846_vm14 = vcmp.eq.s32.totalorder %v2754_v5, %v2764_v7  ;;  %v944_v7 = vsel %vm848_vm1, %v2787_v28, 0.0 }
 0x11c   : > { %v2866_v54 = vpop.permute.xlu1 %1098  ;;  %v763_v30 = vadd.f32 %v731_v57, %v523_v1  ;;  %v939_v1 = vsel %vm843_vm4, %v2683_v41, 0.0  ;;  %v736_v57 = vsel %vm640_vm8, %v2744_v2, 0.0  ;;  %v969_v33 = vadd.f32 %v937_v34, %v2782_v25 }
 0x11d   : > { %vm643_vm4 = vcmp.eq.s32.totalorder %v2739_v62, %v2826_v26  ;;  %vm644_vm8 = vcmp.eq.s32.totalorder %v2754_v5, %v2826_v26 }
 0x11e   : > { %918 = vperm.xlu1 %2280, %v2722_v56   ;;  %v2877_v53 = vpop.permute.xlu0 %839  ;;  %v938_v56 = vsel %vm842_vm3, %v2678_v39, 0.0  ;;  %v940_v39 = vsel %vm844_vm5, %v2683_v41, 0.0  ;;  %v971_v2 = vadd.f32 %v939_v1, %v763_v30  ;;  %v941_v1 = vsel %vm845_vm13, %v2773_v12, 0.0 }
 0x11f   : > { %3386 = vst [vmem:[#allocation20_spill] sm:$0xff] %v2877_v53  ;;  %v3387_v53 = vmov 3   ;;  %vm1055_vm5 = vcmp.eq.s32.totalorder %v2739_v62, %v2799_v20 }
 0x121   : > { %v2893_v29 = vpop.permute.xlu1 %364 }
 0x122   : > { %2281 = vset.pattern.permute.xlu1 %v3387_v53 }
 0x123   : > { %1035 = vperm.xlu1 %2281, %v2579_v17   ;;  %v1003_v37 = vpop.permute.xlu0 %1002  ;;  %v527_v17 = vsel %vm399_vm0, %v2728_v59, 0.0  ;;  %v970_v59 = vadd.f32 %v938_v56, %v2784_v27  ;;  %vm847_vm0 = vcmp.eq.s32.totalorder %v2739_v62, %v2838_v11  ;;  %v768_v56 = vadd.f32 %v736_v57, %v528_v51 }
 0x124   : > { %vm1049_vm11 = vcmp.eq.s32.totalorder %v2739_v62, %v1003_v37  ;;  %vm1050_vm12 = vcmp.eq.s32.totalorder %v2754_v5, %v1003_v37  ;;  %v972_v37 = vadd.f32 %v940_v39, %v764_v32  ;;  %v942_v39 = vsel %vm846_vm14, %v2773_v12, 0.0 }
 0x125   : > { %v1145_v41 = vsel %vm1049_vm11, %v2693_v45, 0.0  ;;  %v1146_v6 = vsel %vm1050_vm12, %v2693_v45, 0.0  ;;  %v974_v43 = vadd.f32 %v942_v39, %v2795_v10  ;;  %v943_v57 = vsel %vm847_vm0, %v2787_v28, 0.0 }
 0x126   : > { %v2929_v58 = vpop.permute.xlu1 %604  ;;  %v1178_v32 = vadd.f32 %v1146_v6, %v970_v59  ;;  %v1177_v34 = vadd.f32 %v1145_v41, %v969_v33  ;;  %v3388_v6 = vmov 0   ;;  %v531_v12 = vsel %vm403_vm6, %v2832_v15, 0.0 }
 0x127   : > { %1122 = vperm.xlu1 %2281, %v2584_v18   ;;  %v1087_v23 = vpop.permute.xlu0 %1086  ;;  %v767_v18 = vadd.f32 %v735_v55, %v527_v17  ;;  %v739_v10 = vsel %vm643_vm4, %v2836_v40, 0.0  ;;  %v976_v41 = vadd.f32 %v944_v7, %v768_v56  ;;  %vm852_vm6 = vcmp.eq.s32.totalorder %v2754_v5, %v2841_v31 }
 0x128   : > { %v1147_v45 = vsel %vm1051_vm9, %v1087_v23, 0.0  ;;  %v1148_v25 = vsel %vm1052_vm10, %v1087_v23, 0.0  ;;  %v973_v23 = vadd.f32 %v941_v1, %v2793_v49  ;;  %vm851_vm9 = vcmp.eq.s32.totalorder %v2739_v62, %v2841_v31 }
 0x129   : > { %v1179_v27 = vadd.f32 %v1147_v45, %v971_v2  ;;  %v1180_v30 = vadd.f32 %v1148_v25, %v972_v37  ;;  %v975_v11 = vadd.f32 %v943_v57, %v767_v18  ;;  %vm849_vm10 = vcmp.eq.s32.totalorder %v2739_v62, %v2844_v36 }
 0x12a   : > { %v2954_v48 = vpop.permute.xlu1 %607  ;;  %vm850_vm11 = vcmp.eq.s32.totalorder %v2754_v5, %v2844_v36  ;;  %v945_v20 = vsel %vm849_vm10, %v2849_v16, 0.0  ;;  %v947_v18 = vsel %vm851_vm9, %v2855_v3, 0.0  ;;  %v771_v1 = vadd.f32 %v739_v10, %v531_v12 }
 0x12b   : > { %2282 = vset.pattern.permute.xlu1 %v3388_v6  ;;  %v1009_v17 = vpop.permute.xlu0 %1008  ;;  %v1210_v51 = vpack.c.bf16 %v1180_v30, %v1178_v32  ;;  %v1209_v55 = vpack.c.bf16 %v1179_v27, %v1177_v34  ;;  %v532_v30 = vsel %vm404_vm15, %v2832_v15, 0.0  ;;  %v740_v32 = vsel %vm644_vm8, %v2836_v40, 0.0 }
 0x12c   : > { %vm1053_vm2 = vcmp.eq.s32.totalorder %v2739_v62, %v1009_v17  ;;  %vm1054_vm3 = vcmp.eq.s32.totalorder %v2754_v5, %v1009_v17  ;;  %382 = vperm.xlu1 %2282, %v2731_v60   ;;  %v946_v34 = vsel %vm850_vm11, %v2849_v16, 0.0  ;;  %v948_v26 = vsel %vm852_vm6, %v2855_v3, 0.0 }
 0x12d   : > { %1234 = vmatprep.subr.bf16.mxu0 %v1210_v51  ;;  %1388 = vmatprep.subr.bf16.mxu1 %v1210_v51  ;;  %v1149_v28 = vsel %vm1053_vm2, %v2804_v24, 0.0  ;;  %v1150_v49 = vsel %vm1054_vm3, %v2804_v24, 0.0  ;;  %v772_v36 = vadd.f32 %v740_v32, %v532_v30  ;;  %v977_v16 = vadd.f32 %v945_v20, %v2822_v13 }
 0x12e   : > { %1235 = vmatpush1.bf16.xpose.msra.mxu0 %v1209_v55  ;;  %1389 = vmatpush1.bf16.xpose.msra.mxu1 %v1209_v55  ;;  %v1181_v37 = vadd.f32 %v1149_v28, %v973_v23  ;;  %v1182_v45 = vadd.f32 %v1150_v49, %v974_v43  ;;  %v978_v39 = vadd.f32 %v946_v34, %v2824_v9 }
 0x12f   : > { %v2987_v33 = vpop.permute.xlu1 %478  ;;  %v1095_v59 = vpop.permute.xlu0 %1094  ;;  %v979_v23 = vadd.f32 %v947_v18, %v771_v1  ;;  %v980_v3 = vadd.f32 %v948_v26, %v772_v36  ;;  %vm1059_vm14 = vcmp.eq.s32.totalorder %v2739_v62, %v2861_v50  ;;  %vm1060_vm15 = vcmp.eq.s32.totalorder %v2754_v5, %v2861_v50 }
 0x130   : > { %v1151_v24 = vsel %vm1055_vm5, %v1095_v59, 0.0  ;;  %v1152_v2 = vsel %vm1056_vm7, %v1095_v59, 0.0  ;;  %2283 = vset.pattern.permute.xlu1 %v3382_v47  ;;  %vm645_vm0 = vcmp.eq.s32.totalorder %v2739_v62, %v2929_v58  ;;  %vm646_vm1 = vcmp.eq.s32.totalorder %v2754_v5, %v2929_v58 }
 0x131   : > { %v1183_v25 = vadd.f32 %v1151_v24, %v975_v11  ;;  %v1184_v27 = vadd.f32 %v1152_v2, %v976_v41  ;;  %622 = vperm.xlu1 %2283, %v2731_v60   ;;  %vm405_vm2 = vcmp.eq.s32.totalorder %v2739_v62, %v2893_v29  ;;  %vm406_vm3 = vcmp.eq.s32.totalorder %v2754_v5, %v2893_v29 }
 0x132   : > { %v741_v10 = vsel %vm645_vm0, %v2802_v52, 0.0  ;;  %v742_v11 = vsel %vm646_vm1, %v2802_v52, 0.0  ;;  %vm407_vm4 = vcmp.eq.s32.totalorder %v2739_v62, %v2685_v42  ;;  %vm408_vm5 = vcmp.eq.s32.totalorder %v2754_v5, %v2685_v42 }
 0x133   : > { %v1015_v56 = vpop.permute.xlu0 %1014  ;;  %v1212_v38 = vpack.c.bf16 %v1184_v27, %v1182_v45  ;;  %v1211_v15 = vpack.c.bf16 %v1183_v25, %v1181_v37  ;;  %vm855_vm7 = vcmp.eq.s32.totalorder %v2739_v62, %v2847_v14  ;;  %vm856_vm8 = vcmp.eq.s32.totalorder %v2754_v5, %v2847_v14 }
 0x134   : > { %vm1057_vm12 = vcmp.eq.s32.totalorder %v2739_v62, %v1015_v56  ;;  %vm1058_vm13 = vcmp.eq.s32.totalorder %v2754_v5, %v1015_v56  ;;  %v695_v40 = vpop.permute.xlu1 %694  ;;  %v533_v29 = vsel %vm405_vm2, %v2690_v44, 0.0  ;;  %v534_v58 = vsel %vm406_vm3, %v2690_v44, 0.0 }
 0x135   : > { %625 = vperm.xlu1 %2283, %v2589_v19   ;;  %1236 = vmatprep.subr.bf16.mxu0 %v1212_v38  ;;  %v1153_v43 = vsel %vm1057_vm12, %v2866_v54, 0.0  ;;  %v1154_v17 = vsel %vm1058_vm13, %v2866_v54, 0.0  ;;  %vm647_vm9 = vcmp.eq.s32.totalorder %v2739_v62, %v2954_v48  ;;  %vm648_vm10 = vcmp.eq.s32.totalorder %v2754_v5, %v2954_v48 }
 0x136   : > { %1390 = vmatprep.subr.bf16.mxu1 %v1212_v38  ;;  %1237 = vmatpush1.bf16.xpose.msra.mxu0 %v1211_v15  ;;  %v1185_v55 = vadd.f32 %v1153_v43, %v977_v16  ;;  %v1186_v9 = vadd.f32 %v1154_v17, %v978_v39  ;;  %v773_v52 = vadd.f32 %v741_v10, %v533_v29  ;;  %v743_v24 = vsel %vm647_vm9, %v695_v40, 0.0 }
 0x137   : > { %1391 = vmatpush1.bf16.xpose.msra.mxu1 %v1211_v15  ;;  %v1103_v13 = vpop.permute.xlu0 %1102  ;;  %v774_v59 = vadd.f32 %v742_v11, %v534_v58  ;;  %v744_v2 = vsel %vm648_vm10, %v695_v40, 0.0  ;;  %v535_v44 = vsel %vm407_vm4, %v2987_v33, 0.0  ;;  %v536_v48 = vsel %vm408_vm5, %v2987_v33, 0.0 }
 0x138   : > { %v1155_v31 = vsel %vm1059_vm14, %v1103_v13, 0.0  ;;  %v1156_v51 = vsel %vm1060_vm15, %v1103_v13, 0.0  ;;  %v775_v32 = vadd.f32 %v743_v24, %v535_v44  ;;  %v776_v20 = vadd.f32 %v744_v2, %v536_v48  ;;  %v3390_v24 = vld [vmem:[#allocation7_spill] sm:$0xff] }
 0x139   : > { %v1187_v57 = vadd.f32 %v1155_v31, %v979_v23  ;;  %v1188_v7 = vadd.f32 %v1156_v51, %v980_v3  ;;  %2284 = vset.pattern.permute.xlu1 %v3388_v6  ;;  %v813_v54 = vpop.permute.xlu1 %812  ;;  %vm411_vm2 = vcmp.eq.s32.totalorder %v2739_v62, %v2695_v46  ;;  %vm412_vm3 = vcmp.eq.s32.totalorder %v2754_v5, %v2695_v46 }
 0x13a   : > { %508 = vperm.xlu1 %2284, %v2742_v63   ;;  %vm853_vm6 = vcmp.eq.s32.totalorder %v2739_v62, %v813_v54  ;;  %vm854_vm11 = vcmp.eq.s32.totalorder %v2754_v5, %v813_v54  ;;  %vm859_vm4 = vcmp.eq.s32.totalorder %v2739_v62, %v2853_v0  ;;  %vm860_vm5 = vcmp.eq.s32.totalorder %v2754_v5, %v2853_v0 }
 0x13b   : > { %v1214_v12 = vpack.c.bf16 %v1188_v7, %v1186_v9  ;;  %v1213_v28 = vpack.c.bf16 %v1187_v57, %v1185_v55  ;;  %v1021_v50 = vpop.permute.xlu0 %1020 }
 0x13c   : > { %vm1061_vm14 = vcmp.eq.s32.totalorder %v2739_v62, %v1021_v50  ;;  %vm1062_vm15 = vcmp.eq.s32.totalorder %v2754_v5, %v1021_v50  ;;  %v3389_v50 = vld [vmem:[#allocation8_spill] sm:$0xff] }
 0x13d   : > { %v899_v49 = vpop.permute.xlu1 %898  ;;  %1238 = vmatprep.subr.bf16.mxu0 %v1214_v12  ;;  %1392 = vmatprep.subr.bf16.mxu1 %v1214_v12 }
 0x13e   : > { %2285 = vset.pattern.permute.xlu1 %v3382_v47  ;;  %1239 = vmatpush1.bf16.xpose.msra.mxu0 %v1213_v28  ;;  %v949_v37 = vsel %vm853_vm6, %v899_v49, 0.0  ;;  %v950_v45 = vsel %vm854_vm11, %v899_v49, 0.0 }
 0x13f   : > { %1393 = vmatpush1.bf16.xpose.msra.mxu1 %v1213_v28  ;;  %718 = vperm.xlu1 %2285, %v2742_v63   ;;  %v1111_v27 = vpop.permute.xlu0 %1110  ;;  %v981_v34 = vadd.f32 %v949_v37, %v773_v52  ;;  %v982_v18 = vadd.f32 %v950_v45, %v774_v59 }
 0x141   : > { %v903_v41 = vpop.permute.xlu1 %902 }
 0x142   : > { %v951_v30 = vsel %vm855_vm7, %v903_v41, 0.0 }
 0x143   : > { %2286 = vset.pattern.permute.xlu1 %v3383_v61  ;;  %v983_v56 = vadd.f32 %v951_v30, %v775_v32  ;;  %v1027_v9 = vpop.permute.xlu0 %1026 }
 0x144   : > { %830 = vperm.xlu1 %2286, %v2731_v60   ;;  %v952_v60 = vsel %vm856_vm8, %v903_v41, 0.0 }
 0x145   : > { %v984_v38 = vadd.f32 %v952_v60, %v776_v20 }
 0x146   : > { %v1024_v25 = vpop.permute.xlu1 %1023 }
 0x147   : > { %vm1063_vm12 = vcmp.eq.s32.totalorder %v2739_v62, %v1024_v25  ;;  %vm1064_vm13 = vcmp.eq.s32.totalorder %v2754_v5, %v1024_v25  ;;  %v1119_v29 = vpop.permute.xlu0 %1118 }
 0x148   : > { %v1159_v42 = vsel %vm1063_vm12, %v1111_v27, 0.0  ;;  %v1160_v33 = vsel %vm1064_vm13, %v1111_v27, 0.0  ;;  %922 = vperm.xlu1 %2286, %v2597_v21  }
 0x149   : > { %v1191_v26 = vadd.f32 %v1159_v42, %v983_v56  ;;  %v1192_v40 = vadd.f32 %v1160_v33, %v984_v38 }
 0x14a   : > { %v1107_v14 = vpop.permute.xlu1 %1106 }
 0x14b   : > { %v1157_v15 = vsel %vm1061_vm14, %v1107_v14, 0.0  ;;  %v1158_v1 = vsel %vm1062_vm15, %v1107_v14, 0.0  ;;  %vm1065_vm14 = vcmp.eq.s32.totalorder %v2739_v62, %v1027_v9  ;;  %vm1066_vm15 = vcmp.eq.s32.totalorder %v2754_v5, %v1027_v9 }
 0x14c   : > { %v1189_v36 = vadd.f32 %v1157_v15, %v981_v34  ;;  %v1190_v16 = vadd.f32 %v1158_v1, %v982_v18  ;;  %926 = vperm.xlu1 %2286, %v2742_v63   ;;  %v2299_v18 = vld [vmem:[%s3131_s13 + $0x4] ss:$8 sps:$4 sm:$0xff]  }
 0x14d   : > { %1420 = vmatprep.mubr.bf16.mxu1 %v2299_v18  ;;  %v3391_v15 = vld [vmem:[#allocation9_spill] sm:$0xff]  ;;  %v3392_v1 = vld [vmem:[#allocation18_spill] sm:$0xff] }
 0x14e   : > { %v1216_v39 = vpack.c.bf16 %v1192_v40, %v1190_v16  ;;  %v1215_v23 = vpack.c.bf16 %v1191_v26, %v1189_v36  ;;  %v1033_v36 = vpop.permute.xlu0 %1032 }
 0x14f   : > { %v371_v43 = vpop.permute.xlu1 %370 }
 0x150   : > { %1240 = vmatprep.subr.bf16.mxu0 %v1216_v39  ;;  %1394 = vmatprep.subr.bf16.mxu1 %v1216_v39  ;;  %vm409_vm9 = vcmp.eq.s32.totalorder %v2739_v62, %v371_v43  ;;  %vm410_vm10 = vcmp.eq.s32.totalorder %v2754_v5, %v371_v43 }
 0x151   : > { %2287 = vset.pattern.permute.xlu1 %v3387_v53  ;;  %1241 = vmatpush1.bf16.xpose.msra.mxu0 %v1215_v23  ;;  %v537_v10 = vsel %vm409_vm9, %v3389_v50, 0.0  ;;  %v538_v11 = vsel %vm410_vm10, %v3389_v50, 0.0 }
 0x152   : > { %1041 = vperm.xlu1 %2287, %v2589_v19   ;;  %1395 = vmatpush1.bf16.xpose.msra.mxu1 %v1215_v23  ;;  %v1127_v9 = vpop.permute.xlu0 %1126 }
 0x154   : > { %v611_v17 = vpop.permute.xlu1 %610 }
 0x155   : > { %vm649_vm7 = vcmp.eq.s32.totalorder %v2739_v62, %v611_v17  ;;  %vm650_vm8 = vcmp.eq.s32.totalorder %v2754_v5, %v611_v17 }
 0x156   : > { %1130 = vperm.xlu1 %2287, %v2597_v21   ;;  %v745_v28 = vsel %vm649_vm7, %v2807_v35, 0.0  ;;  %v746_v49 = vsel %vm650_vm8, %v2807_v35, 0.0 }
 0x157   : > { %v778_v35 = vadd.f32 %v746_v49, %v538_v11 }
 0x158   : > { %v614_v3 = vpop.permute.xlu1 %613 }
 0x159   : > { %vm651_vm0 = vcmp.eq.s32.totalorder %v2739_v62, %v614_v3  ;;  %vm652_vm1 = vcmp.eq.s32.totalorder %v2754_v5, %v614_v3 }
 0x15a   : > { %2288 = vset.pattern.permute.xlu1 %v3388_v6 }
 0x15b   : > { %388 = vperm.xlu1 %2288, %v2751_v4  }
 0x15d   : > { %v489_v63 = vpop.permute.xlu1 %488 }
 0x15e   : > { %v540_v55 = vsel %vm412_vm3, %v489_v63, 0.0  ;;  %vm416_vm3 = vcmp.eq.s32.totalorder %v2754_v5, %v3391_v15 }
 0x15f   : > { %2289 = vset.pattern.permute.xlu1 %v3382_v47 }
 0x160   : > { %628 = vperm.xlu1 %2289, %v2751_v4  }
 0x162   : > { %v703_v13 = vpop.permute.xlu1 %702 }
 0x163   : > { %v747_v21 = vsel %vm651_vm0, %v703_v13, 0.0  ;;  %v748_v51 = vsel %vm652_vm1, %v703_v13, 0.0  ;;  %v3393_v13 = vld [vmem:[#allocation15_spill] sm:$0xff] }
 0x164   : > { %631 = vperm.xlu1 %2289, %v2603_v22   ;;  %v780_v7 = vadd.f32 %v748_v51, %v540_v55 }
 0x167   : > { %v819_v31 = vpop.permute.xlu1 %818 }
 0x168   : > { %2291 = vset.pattern.permute.xlu1 %v3388_v6  ;;  %v539_v6 = vsel %vm411_vm2, %v489_v63, 0.0  ;;  %vm857_vm6 = vcmp.eq.s32.totalorder %v2739_v62, %v819_v31  ;;  %vm858_vm11 = vcmp.eq.s32.totalorder %v2754_v5, %v819_v31  ;;  %vm415_vm2 = vcmp.eq.s32.totalorder %v2739_v62, %v3391_v15 }
 0x169   : > { %518 = vperm.xlu1 %2291, %v2767_v8   ;;  %v779_v57 = vadd.f32 %v747_v21, %v539_v6  ;;  %v3394_v21 = vld [vmem:[#allocation10_spill] sm:$0xff] }
 0x16b   : > { %v907_v19 = vpop.permute.xlu1 %906 }
 0x16c   : > { %v953_v58 = vsel %vm857_vm6, %v907_v19, 0.0  ;;  %v954_v52 = vsel %vm858_vm11, %v907_v19, 0.0 }
 0x16d   : > { %2293 = vset.pattern.permute.xlu1 %v3382_v47  ;;  %v986_v44 = vadd.f32 %v954_v52, %v778_v35 }
 0x16e   : > { %726 = vperm.xlu1 %2293, %v2767_v8  }
 0x16f   : > { %v911_v54 = vpop.permute.xlu1 %910 }
 0x170   : > { %v955_v46 = vsel %vm859_vm4, %v911_v54, 0.0  ;;  %v956_v12 = vsel %vm860_vm5, %v911_v54, 0.0  ;;  %vm863_vm4 = vcmp.eq.s32.totalorder %v2739_v62, %v3392_v1  ;;  %vm864_vm5 = vcmp.eq.s32.totalorder %v2754_v5, %v3392_v1  ;;  %v3398_v1 = vld [vmem:[#allocation12_spill] sm:$0xff] }
 0x171   : > { %v987_v0 = vadd.f32 %v955_v46, %v779_v57  ;;  %v988_v47 = vadd.f32 %v956_v12, %v780_v7 }
 0x172   : > { %2294 = vset.pattern.permute.xlu1 %v3383_v61  ;;  %v777_v61 = vadd.f32 %v745_v28, %v537_v10 }
 0x173   : > { %836 = vperm.xlu1 %2294, %v2751_v4  }
 0x174   : > { %v1030_v41 = vpop.permute.xlu1 %1029  ;;  %v985_v2 = vadd.f32 %v953_v58, %v777_v61 }
 0x175   : > { %vm1067_vm12 = vcmp.eq.s32.totalorder %v2739_v62, %v1030_v41  ;;  %vm1068_vm13 = vcmp.eq.s32.totalorder %v2754_v5, %v1030_v41 }
 0x176   : > { %v1163_v4 = vsel %vm1067_vm12, %v1119_v29, 0.0  ;;  %v1164_v59 = vsel %vm1068_vm13, %v1119_v29, 0.0 }
 0x177   : > { %930 = vperm.xlu1 %2294, %v3390_v24   ;;  %v1195_v25 = vadd.f32 %v1163_v4, %v987_v0  ;;  %v1196_v27 = vadd.f32 %v1164_v59, %v988_v47  ;;  %v3162_v59 = vld [vmem:[%s288_s24] sm:$0xff] }
 0x178   : > { %v1115_v48 = vpop.permute.xlu1 %1114 }
 0x179   : > { %v1161_v37 = vsel %vm1065_vm14, %v1115_v48, 0.0  ;;  %v1162_v45 = vsel %vm1066_vm15, %v1115_v48, 0.0  ;;  %vm1069_vm14 = vcmp.eq.s32.totalorder %v2739_v62, %v1033_v36  ;;  %vm1070_vm15 = vcmp.eq.s32.totalorder %v2754_v5, %v1033_v36 }
 0x17a   : > { %v1193_v30 = vadd.f32 %v1161_v37, %v985_v2  ;;  %v1194_v60 = vadd.f32 %v1162_v45, %v986_v44 }
 0x17b   : > { %934 = vperm.xlu1 %2294, %v2767_v8  }
 0x17c   : > { %v1218_v32 = vpack.c.bf16 %v1196_v27, %v1194_v60  ;;  %v1217_v20 = vpack.c.bf16 %v1195_v25, %v1193_v30  ;;  %v3395_v30 = vld [vmem:[#allocation11_spill] sm:$0xff] }
 0x17d   : > { %v377_v42 = vpop.permute.xlu1 %376 }
 0x17e   : > { %1242 = vmatprep.subr.bf16.mxu0 %v1218_v32  ;;  %1396 = vmatprep.subr.bf16.mxu1 %v1218_v32  ;;  %vm413_vm9 = vcmp.eq.s32.totalorder %v2739_v62, %v377_v42  ;;  %vm414_vm10 = vcmp.eq.s32.totalorder %v2754_v5, %v377_v42 }
 0x17f   : > { %2296 = vset.pattern.permute.xlu1 %v3387_v53  ;;  %1243 = vmatpush1.bf16.xpose.msra.mxu0 %v1217_v20  ;;  %v541_v51 = vsel %vm413_vm9, %v3394_v21, 0.0  ;;  %v542_v6 = vsel %vm414_vm10, %v3394_v21, 0.0 }
 0x180   : > { %1047 = vperm.xlu1 %2296, %v2603_v22   ;;  %1397 = vmatpush1.bf16.xpose.msra.mxu1 %v1217_v20  ;;  %v3396_v20 = vld [vmem:[#allocation19_spill] sm:$0xff] }
 0x182   : > { %v617_v33 = vpop.permute.xlu1 %616 }
 0x183   : > { %vm653_vm7 = vcmp.eq.s32.totalorder %v2739_v62, %v617_v33  ;;  %vm654_vm8 = vcmp.eq.s32.totalorder %v2754_v5, %v617_v33 }
 0x184   : > { %1138 = vperm.xlu1 %2296, %v3390_v24   ;;  %v749_v31 = vsel %vm653_vm7, %v3393_v13, 0.0  ;;  %v750_v19 = vsel %vm654_vm8, %v3393_v13, 0.0  ;;  %v1930_v24 = vcombine.high %v3162_v59, %v3162_v59 }
 0x185   : > { %v781_v54 = vadd.f32 %v749_v31, %v541_v51  ;;  %v782_v46 = vadd.f32 %v750_v19, %v542_v6 }
 0x186   : > { %v620_v34 = vpop.permute.xlu1 %619  ;;  %1266 = vmatprep.mubr.bf16.mxu0 %v1930_v24 }
 0x187   : > { %vm655_vm0 = vcmp.eq.s32.totalorder %v2739_v62, %v620_v34  ;;  %vm656_vm1 = vcmp.eq.s32.totalorder %v2754_v5, %v620_v34 }
 0x18b   : > { %v499_v8 = vpop.permute.xlu1 %498 }
 0x18c   : > { %v543_v26 = vsel %vm415_vm2, %v499_v8, 0.0  ;;  %v544_v40 = vsel %vm416_vm3, %v499_v8, 0.0  ;;  %vm419_vm2 = vcmp.eq.s32.totalorder %v2739_v62, %v3395_v30  ;;  %vm420_vm3 = vcmp.eq.s32.totalorder %v2754_v5, %v3395_v30  ;;  %v1039_v8 = vpop.permute.xlu0 %1038  ;;  %v3402_v30 = vld [vmem:[#allocation14_spill] sm:$0xff] }
 0x190   : > { %v711_v56 = vpop.permute.xlu1 %710 }
 0x191   : > { %v751_v53 = vsel %vm655_vm0, %v711_v56, 0.0  ;;  %v752_v14 = vsel %vm656_vm1, %v711_v56, 0.0 }
 0x192   : > { %v783_v16 = vadd.f32 %v751_v53, %v543_v26  ;;  %v784_v39 = vadd.f32 %v752_v14, %v544_v40  ;;  %v3397_v53 = vld [vmem:[#allocation16_spill] sm:$0xff] }
 0x195   : > { %v825_v38 = vpop.permute.xlu1 %824 }
 0x196   : > { %vm861_vm6 = vcmp.eq.s32.totalorder %v2739_v62, %v825_v38  ;;  %vm862_vm11 = vcmp.eq.s32.totalorder %v2754_v5, %v825_v38 }
 0x199   : > { %v915_v22 = vpop.permute.xlu1 %914 }
 0x19a   : > { %v957_v57 = vsel %vm861_vm6, %v915_v22, 0.0  ;;  %v958_v7 = vsel %vm862_vm11, %v915_v22, 0.0 }
 0x19b   : > { %v989_v47 = vadd.f32 %v957_v57, %v781_v54  ;;  %v990_v28 = vadd.f32 %v958_v7, %v782_v46 }
 0x19d   : > { %v919_v23 = vpop.permute.xlu1 %918 }
 0x19e   : > { %v959_v43 = vsel %vm863_vm4, %v919_v23, 0.0  ;;  %v960_v17 = vsel %vm864_vm5, %v919_v23, 0.0  ;;  %vm867_vm4 = vcmp.eq.s32.totalorder %v2739_v62, %v3396_v20  ;;  %vm868_vm5 = vcmp.eq.s32.totalorder %v2754_v5, %v3396_v20 }
 0x19f   : > { %v991_v3 = vadd.f32 %v959_v43, %v783_v16  ;;  %v992_v63 = vadd.f32 %v960_v17, %v784_v39  ;;  %v1135_v17 = vpop.permute.xlu0 %1134 }
 0x1a2   : > { %v1036_v55 = vpop.permute.xlu1 %1035 }
 0x1a3   : > { %vm1071_vm12 = vcmp.eq.s32.totalorder %v2739_v62, %v1036_v55  ;;  %vm1072_vm13 = vcmp.eq.s32.totalorder %v2754_v5, %v1036_v55  ;;  %v1045_v24 = vpop.permute.xlu0 %1044 }
 0x1a4   : > { %v1167_v12 = vsel %vm1071_vm12, %v1127_v9, 0.0  ;;  %v1168_v0 = vsel %vm1072_vm13, %v1127_v9, 0.0 }
 0x1a5   : > { %v1199_v11 = vadd.f32 %v1167_v12, %v991_v3  ;;  %v1200_v41 = vadd.f32 %v1168_v0, %v992_v63 }
 0x1a6   : > { %v1123_v49 = vpop.permute.xlu1 %1122 }
 0x1a7   : > { %v1165_v50 = vsel %vm1069_vm14, %v1123_v49, 0.0  ;;  %v1166_v10 = vsel %vm1070_vm15, %v1123_v49, 0.0  ;;  %vm1073_vm14 = vcmp.eq.s32.totalorder %v2739_v62, %v1039_v8  ;;  %vm1074_vm15 = vcmp.eq.s32.totalorder %v2754_v5, %v1039_v8 }
 0x1a8   : > { %v1197_v29 = vadd.f32 %v1165_v50, %v989_v47  ;;  %v1198_v58 = vadd.f32 %v1166_v10, %v990_v28 }
 0x1aa   : > { %v1220_v52 = vpack.c.bf16 %v1200_v41, %v1198_v58  ;;  %v1219_v61 = vpack.c.bf16 %v1199_v11, %v1197_v29  ;;  %v3399_v41 = vld [vmem:[#allocation13_spill] sm:$0xff] }
 0x1ab   : > { %v383_v35 = vpop.permute.xlu1 %382 }
 0x1ac   : > { %1244 = vmatprep.subr.bf16.mxu0 %v1220_v52  ;;  %1398 = vmatprep.subr.bf16.mxu1 %v1220_v52  ;;  %vm417_vm9 = vcmp.eq.s32.totalorder %v2739_v62, %v383_v35  ;;  %vm418_vm10 = vcmp.eq.s32.totalorder %v2754_v5, %v383_v35  ;;  %v3400_v52 = vld [vmem:[#allocation20_spill] sm:$0xff] }
 0x1ad   : > { %1245 = vmatpush1.bf16.xpose.msra.mxu0 %v1219_v61  ;;  %1399 = vmatpush1.bf16.xpose.msra.mxu1 %v1219_v61  ;;  %v545_v26 = vsel %vm417_vm9, %v3398_v1, 0.0  ;;  %v546_v40 = vsel %vm418_vm10, %v3398_v1, 0.0 }
 0x1b0   : > { %v623_v4 = vpop.permute.xlu1 %622 }
 0x1b1   : > { %vm657_vm7 = vcmp.eq.s32.totalorder %v2739_v62, %v623_v4  ;;  %vm658_vm8 = vcmp.eq.s32.totalorder %v2754_v5, %v623_v4 }
 0x1b2   : > { %v753_v14 = vsel %vm657_vm7, %v3397_v53, 0.0  ;;  %v754_v15 = vsel %vm658_vm8, %v3397_v53, 0.0 }
 0x1b3   : > { %v785_v23 = vadd.f32 %v753_v14, %v545_v26  ;;  %v786_v43 = vadd.f32 %v754_v15, %v546_v40 }
 0x1b4   : > { %v626_v2 = vpop.permute.xlu1 %625 }
 0x1b5   : > { %vm659_vm0 = vcmp.eq.s32.totalorder %v2739_v62, %v626_v2  ;;  %vm660_vm1 = vcmp.eq.s32.totalorder %v2754_v5, %v626_v2 }
 0x1b9   : > { %v509_v44 = vpop.permute.xlu1 %508 }
 0x1ba   : > { %v547_v60 = vsel %vm419_vm2, %v509_v44, 0.0  ;;  %v548_v32 = vsel %vm420_vm3, %v509_v44, 0.0  ;;  %vm423_vm2 = vcmp.eq.s32.totalorder %v2739_v62, %v3399_v41  ;;  %vm424_vm3 = vcmp.eq.s32.totalorder %v2754_v5, %v3399_v41 }
 0x1be   : > { %v719_v48 = vpop.permute.xlu1 %718 }
 0x1bf   : > { %v755_v25 = vsel %vm659_vm0, %v719_v48, 0.0  ;;  %v756_v27 = vsel %vm660_vm1, %v719_v48, 0.0 }
 0x1c0   : > { %v787_v42 = vadd.f32 %v755_v25, %v547_v60  ;;  %v788_v33 = vadd.f32 %v756_v27, %v548_v32 }
 0x1c3   : > { %v831_v37 = vpop.permute.xlu1 %830 }
 0x1c4   : > { %vm865_vm6 = vcmp.eq.s32.totalorder %v2739_v62, %v831_v37  ;;  %vm866_vm11 = vcmp.eq.s32.totalorder %v2754_v5, %v831_v37 }
 0x1c7   : > { %v923_v45 = vpop.permute.xlu1 %922 }
 0x1c8   : > { %v961_v16 = vsel %vm865_vm6, %v923_v45, 0.0  ;;  %v962_v39 = vsel %vm866_vm11, %v923_v45, 0.0  ;;  %v3401_v45 = vld [vmem:[#allocation17_spill] sm:$0xff] }
 0x1c9   : > { %v993_v13 = vadd.f32 %v961_v16, %v785_v23  ;;  %v994_v31 = vadd.f32 %v962_v39, %v786_v43  ;;  %v2300_v43 = vld [vmem:[%s3131_s13 + $0x14] ss:$8 sps:$4 sm:$0xff]  }
 0x1cb   : > { %v927_v34 = vpop.permute.xlu1 %926 }
 0x1cc   : > { %v963_v18 = vsel %vm867_vm4, %v927_v34, 0.0  ;;  %v964_v56 = vsel %vm868_vm5, %v927_v34, 0.0  ;;  %vm871_vm4 = vcmp.eq.s32.totalorder %v2739_v62, %v3400_v52  ;;  %vm872_vm5 = vcmp.eq.s32.totalorder %v2754_v5, %v3400_v52  ;;  %v1143_v34 = vpop.permute.xlu0 %1142 }
 0x1cd   : > { %v995_v38 = vadd.f32 %v963_v18, %v787_v42  ;;  %v996_v22 = vadd.f32 %v964_v56, %v788_v33 }
 0x1d1   : > { %v1042_v36 = vpop.permute.xlu1 %1041 }
 0x1d2   : > { %vm1075_vm12 = vcmp.eq.s32.totalorder %v2739_v62, %v1042_v36  ;;  %vm1076_vm13 = vcmp.eq.s32.totalorder %v2754_v5, %v1042_v36 }
 0x1d3   : > { %v1171_v3 = vsel %vm1075_vm12, %v1135_v17, 0.0  ;;  %v1172_v63 = vsel %vm1076_vm13, %v1135_v17, 0.0  ;;  %v2302_v17 = vld [vmem:[%s3131_s13 + $0x10] ss:$8 sps:$4 sm:$0xff]  }
 0x1d4   : > { %v1203_v6 = vadd.f32 %v1171_v3, %v995_v38  ;;  %v1204_v55 = vadd.f32 %v1172_v63, %v996_v22  ;;  %v2303_v3 = vld [vmem:[%s3131_s13 + $0x24] ss:$8 sps:$4 sm:$0xff]   ;;  %v2305_v63 = vld [vmem:[%s3131_s13 + $0x20] ss:$8 sps:$4 sm:$0xff]  }
 0x1d5   : > { %v1131_v19 = vpop.permute.xlu1 %1130 }
 0x1d6   : > { %v1169_v21 = vsel %vm1073_vm14, %v1131_v19, 0.0  ;;  %v1170_v51 = vsel %vm1074_vm15, %v1131_v19, 0.0  ;;  %vm1077_vm14 = vcmp.eq.s32.totalorder %v2739_v62, %v1045_v24  ;;  %vm1078_vm15 = vcmp.eq.s32.totalorder %v2754_v5, %v1045_v24  ;;  %v2311_v19 = vld [vmem:[%s3131_s13 + $0x40] ss:$8 sps:$4 sm:$0xff]  }
 0x1d7   : > { %v1201_v9 = vadd.f32 %v1169_v21, %v993_v13  ;;  %v1202_v57 = vadd.f32 %v1170_v51, %v994_v31  ;;  %v2306_v13 = vld [vmem:[%s3131_s13 + $0x34] ss:$8 sps:$4 sm:$0xff]   ;;  %v2308_v31 = vld [vmem:[%s3131_s13 + $0x30] ss:$8 sps:$4 sm:$0xff]  }
 0x1d8   : > { %v2314_v21 = vld [vmem:[%s3131_s13 + $0x54] ss:$8 sps:$4 sm:$0xff]   ;;  %v2316_v51 = vld [vmem:[%s3131_s13 + $0x50] ss:$8 sps:$4 sm:$0xff]  }
 0x1d9   : > { %v1222_v7 = vpack.c.bf16 %v1204_v55, %v1202_v57  ;;  %v1221_v54 = vpack.c.bf16 %v1203_v6, %v1201_v9  ;;  %v2317_v6 = vld [vmem:[%s3131_s13 + $0x64] ss:$8 sps:$4 sm:$0xff]   ;;  %v2319_v55 = vld [vmem:[%s3131_s13 + $0x60] ss:$8 sps:$4 sm:$0xff]   ;;  %v2320_v9 = vld [vmem:[%s3131_s13 + $0x74] ss:$8 sps:$4 sm:$0xff]  }
 0x1da   : > { %v389_v46 = vpop.permute.xlu1 %388  ;;  %v2322_v57 = vld [vmem:[%s3131_s13 + $0x70] ss:$8 sps:$4 sm:$0xff]  }
 0x1db   : > { %1246 = vmatprep.subr.bf16.mxu0 %v1222_v7  ;;  %1400 = vmatprep.subr.bf16.mxu1 %v1222_v7  ;;  %vm421_vm9 = vcmp.eq.s32.totalorder %v2739_v62, %v389_v46  ;;  %vm422_vm10 = vcmp.eq.s32.totalorder %v2754_v5, %v389_v46  ;;  %v2415_v7 = vmov 0.0|0.0  }
 0x1dc   : > { %1247 = vmatpush1.bf16.xpose.msra.mxu0 %v1221_v54  ;;  %1401 = vmatpush1.bf16.xpose.msra.mxu1 %v1221_v54  ;;  %v549_v60 = vsel %vm421_vm9, %v3402_v30, 0.0  ;;  %v550_v32 = vsel %vm422_vm10, %v3402_v30, 0.0  ;;  %v2417_v54 = vmov 0.0  }
 0x1df   : > { %v629_v12 = vpop.permute.xlu1 %628 }
 0x1e0   : > { %vm661_vm7 = vcmp.eq.s32.totalorder %v2739_v62, %v629_v12  ;;  %vm662_vm8 = vcmp.eq.s32.totalorder %v2754_v5, %v629_v12 }
 0x1e1   : > { %v757_v25 = vsel %vm661_vm7, %v3401_v45, 0.0  ;;  %v758_v27 = vsel %vm662_vm8, %v3401_v45, 0.0 }
 0x1e2   : > { %v789_v8 = vadd.f32 %v757_v25, %v549_v60  ;;  %v790_v18 = vadd.f32 %v758_v27, %v550_v32 }
 0x1e3   : > { %v632_v0 = vpop.permute.xlu1 %631 }
 0x1e4   : > { %vm663_vm0 = vcmp.eq.s32.totalorder %v2739_v62, %v632_v0  ;;  %vm664_vm1 = vcmp.eq.s32.totalorder %v2754_v5, %v632_v0 }
 0x1e8   : > { %v519_v47 = vpop.permute.xlu1 %518 }
 0x1e9   : > { %v551_v29 = vsel %vm423_vm2, %v519_v47, 0.0  ;;  %v552_v58 = vsel %vm424_vm3, %v519_v47, 0.0 }
 0x1ed   : > { %v727_v28 = vpop.permute.xlu1 %726 }
 0x1ee   : > { %v759_v10 = vsel %vm663_vm0, %v727_v28, 0.0  ;;  %v760_v11 = vsel %vm664_vm1, %v727_v28, 0.0  ;;  %vm2416_vm0 = vmmov 0  }
 0x1ef   : > { %v791_v61 = vadd.f32 %v759_v10, %v551_v29  ;;  %v792_v35 = vadd.f32 %v760_v11, %v552_v58 }
 0x1f2   : > { %v837_v49 = vpop.permute.xlu1 %836 }
 0x1f3   : > { %vm869_vm6 = vcmp.eq.s32.totalorder %v2739_v62, %v837_v49  ;;  %vm870_vm11 = vcmp.eq.s32.totalorder %v2754_v5, %v837_v49 }
 0x1f6   : > { %v931_v50 = vpop.permute.xlu1 %930 }
 0x1f7   : > { %v965_v42 = vsel %vm869_vm6, %v931_v50, 0.0  ;;  %v966_v33 = vsel %vm870_vm11, %v931_v50, 0.0 }
 0x1f8   : > { %v997_v22 = vadd.f32 %v965_v42, %v789_v8  ;;  %v998_v53 = vadd.f32 %v966_v33, %v790_v18 }
 0x1fa   : > { %v935_v4 = vpop.permute.xlu1 %934 }
 0x1fb   : > { %v967_v2 = vsel %vm871_vm4, %v935_v4, 0.0  ;;  %v968_v44 = vsel %vm872_vm5, %v935_v4, 0.0 }
 0x1fc   : > { %v999_v48 = vadd.f32 %v967_v2, %v791_v61  ;;  %v1000_v37 = vadd.f32 %v968_v44, %v792_v35 }
 0x1ff   : > { %v1048_v20 = vpop.permute.xlu1 %1047 }
 0x200   : > { %vm1079_vm12 = vcmp.eq.s32.totalorder %v2739_v62, %v1048_v20  ;;  %vm1080_vm13 = vcmp.eq.s32.totalorder %v2754_v5, %v1048_v20  ;;  %v2297_v62 = vld [vmem:[%s3131_s13] ss:$8 sps:$4 sm:$0xff]   ;;  %v1929_v5 = vcombine.low %v3162_v59, %v3162_v59  ;;  %v2309_v59 = vld [vmem:[%s3131_s13 + $0x44] ss:$8 sps:$4 sm:$0xff]   ;;  %s2337_s13 = scalar_lea.vmem %s2336_s12, 256 }
 0x201   : > { %v1175_v56 = vsel %vm1079_vm12, %v1143_v34, 0.0  ;;  %v1176_v38 = vsel %vm1080_vm13, %v1143_v34, 0.0  ;;  %p2339_p2 = scmp.lt.s32.totalorder %s2337_s13, %s2331_s11 }
 0x202   : > { %v1207_v26 = vadd.f32 %v1175_v56, %v999_v48  ;;  %v1208_v40 = vadd.f32 %v1176_v38, %v1000_v37 }
 0x203   : > { %v1139_v14 = vpop.permute.xlu1 %1138  ;;  %p2340_p3 = por %p2339_p2, %p2338_p1 }
 0x204   : > { %v1173_v15 = vsel %vm1077_vm14, %v1139_v14, 0.0  ;;  %v1174_v1 = vsel %vm1078_vm15, %v1139_v14, 0.0 }
 0x205   : > { %v1205_v36 = vadd.f32 %v1173_v15, %v997_v22  ;;  %v1206_v16 = vadd.f32 %v1174_v1, %v998_v53  ;;  %p2341_p5 = pnand %p2340_p3, %p2334_p0 }
 0x207   : > { %v1224_v39 = vpack.c.bf16 %v1208_v40, %v1206_v16  ;;  %v1223_v23 = vpack.c.bf16 %v1207_v26, %v1205_v36 }
 0x209   : > { %1248 = vmatprep.subr.bf16.mxu0 %v1224_v39  ;;  %1402 = vmatprep.subr.bf16.mxu1 %v1224_v39 }
 0x20a   : > { %1249 = vmatpush1.bf16.xpose.msra.mxu0 %v1223_v23  ;;  %1403 = vmatpush1.bf16.xpose.msra.mxu1 %v1223_v23 }
 0x20b   : > { %2111 = vmatprep.subr.bf16.mxu0 %v2415_v7  ;;  %2135 = vmatprep.subr.bf16.mxu1 %v2415_v7 }
 0x211   : > { %1421 = vmatmul.mubr.bf16.vlgmr.msra.gmra.mrb[0].mxu1 %v2297_v62  ;;  %1267 = vmatmul.mubr.bf16.vlgmr.msra.gmra.mrb[0].mxu0 %v1929_v5 }
 0x212   : > { %1428 = vmatprep.mubr.bf16.mxu1 %v2300_v43  ;;  %2038 = vmatprep.mubr.msk.f32.mxu0 %vm2416_vm0, %v2417_v54 }
 0x219   : > { %1429 = vmatmul.mubr.bf16.gmra.mrb[4].mxu1 %v2302_v17 }
 0x21a   : > { %1436 = vmatprep.mubr.bf16.mxu1 %v2303_v3 }
 0x221   : > { %1437 = vmatmul.mubr.bf16.gmra.mrb[8].mxu1 %v2305_v63 }
 0x222   : > { %1444 = vmatprep.mubr.bf16.mxu1 %v2306_v13 }
 0x229   : > { %1445 = vmatmul.mubr.bf16.gmra.mrb[12].mxu1 %v2308_v31 }
 0x22a   : > { %1452 = vmatprep.mubr.bf16.mxu1 %v2309_v59 }
 0x231   : > { %1453 = vmatmul.mubr.bf16.gmra.mrb[16].mxu1 %v2311_v19 }
 0x232   : > { %1460 = vmatprep.mubr.bf16.mxu1 %v2314_v21 }
 0x239   : > { %1461 = vmatmul.mubr.bf16.gmra.mrb[20].mxu1 %v2316_v51 }
 0x23a   : > { %1468 = vmatprep.mubr.bf16.mxu1 %v2317_v6 }
 0x241   : > { %1469 = vmatmul.mubr.bf16.gmra.mrb[24].mxu1 %v2319_v55 }
 0x242   : > { %1476 = vmatprep.mubr.bf16.mxu1 %v2320_v9 }
 0x249   : > { %1477 = vmatmul.mubr.bf16.gmra.mrb[28].mxu1 %v2322_v57  ;;  %v2418_v57 = vmov 1.0  }
 0x24a   : > { %2073 = vmatprep.mubr.msk.f32.mxu1 %vm2416_vm0, %v2417_v54 }
 0x2e4   : > { %v1422_v46 = vpop.f32.mrb[0].mxu1  ;;  %v3237_v12 = vpop.f32.mrb[0].mxu0 }
 0x2e5   : > { %v1424_v0 = vpop.f32.mrb[1].mxu1  ;;  %v1537_v47 = vand.u32 2147483647, %v3237_v12  ;;  %v1270_v28 = vpop.f32.mrb[1].mxu0  ;;  %vm1554_vm1 = vcmp.ge.f32.partialorder %v3237_v12, 0.0  ;;  %v1541_v22 = vmax.f32 %v3237_v12, 0.0 }
 0x2e6   : > { %v1425_v49 = vpop.f32.mrb[2].mxu1  ;;  %v1271_v50 = vpop.f32.mrb[2].mxu0 }
 0x2e7   : > { %v3240_v10 = vpack.c.bf16 %v1425_v49, %v1422_v46  ;;  %v1427_v11 = vpop.f32.mrb[3].mxu1  ;;  %v1538_v41 = vsub.f32 0.0, %v1537_v47  ;;  %v1272_v29 = vpop.f32.mrb[3].mxu0  ;;  %v3403_v47 = vlaneseq }
 0x2e9   : > { %2113 = vmatpush3.bf16.xpose.msra.mxu0 %v3240_v10  ;;  %2137 = vmatpush3.bf16.xpose.msra.mxu1 %v3240_v10  ;;  %v1539_v58 = vmul.f32 1.442695, %v1538_v41  ;;  %v1774_v28 = vshrl.u32 %v3403_v47, 7 }
 0x2ea   : > { %2114 = vmatprep.subr.bf16.mxu0 %v2415_v7  ;;  %2138 = vmatprep.subr.bf16.mxu1 %v2415_v7 }
 0x2eb   : > { %2323 = vpow2.f32 %v1539_v58  ;;  %v1775_v49 = vsub.s32 0, %v1774_v28 }
 0x2ec   : > { %v1430_v52 = vpop.f32.mrb[4].mxu1 }
 0x2ed   : > { %v1432_v61 = vpop.f32.mrb[5].mxu1 }
 0x2ee   : > { %v1433_v35 = vpop.f32.mrb[6].mxu1 }
 0x2ef   : > { %v3246_v4 = vpack.c.bf16 %v1433_v35, %v1430_v52  ;;  %v1435_v24 = vpop.f32.mrb[7].mxu1 }
 0x2f1   : > { %2116 = vmatpush3.bf16.xpose.msra.mxu0 %v3246_v4  ;;  %2140 = vmatpush3.bf16.xpose.msra.mxu1 %v3246_v4 }
 0x2f2   : > { %2117 = vmatprep.subr.bf16.mxu0 %v2415_v7  ;;  %2141 = vmatprep.subr.bf16.mxu1 %v2415_v7 }
 0x2f4   : > { %v1438_v2 = vpop.f32.mrb[8].mxu1 }
 0x2f5   : > { %v2324_v44 = vpop.eup %2323  ;;  %v1440_v48 = vpop.f32.mrb[9].mxu1 }
 0x2f6   : > { %v1441_v37 = vpop.f32.mrb[10].mxu1  ;;  %v1542_v45 = vadd.f32 1.0, %v2324_v44  ;;  %v1545_v30 = vmul.f32 -0.5, %v2324_v44  ;;  %v1548_v8 = vand.u32 2147483647, %v2324_v44 }
 0x2f7   : > { %v3252_v25 = vpack.c.bf16 %v1441_v37, %v1438_v2  ;;  %v1443_v27 = vpop.f32.mrb[11].mxu1 }
 0x2f8   : > { %2325 = vrcp.f32 %v1542_v45  ;;  %v1546_v42 = vadd.f32 1.0, %v1545_v30  ;;  %vm1549_vm2 = vcmp.lt.f32.partialorder %v1548_v8, 0.0004427343 }
 0x2f9   : > { %2119 = vmatpush3.bf16.xpose.msra.mxu0 %v3252_v25  ;;  %2143 = vmatpush3.bf16.xpose.msra.mxu1 %v3252_v25  ;;  %2327 = vlog2.f32 %v1542_v45 }
 0x2fa   : > { %2120 = vmatprep.subr.bf16.mxu0 %v2415_v7  ;;  %2144 = vmatprep.subr.bf16.mxu1 %v2415_v7  ;;  %v1547_v56 = vmul.f32 %v2324_v44, %v1546_v42 }
 0x2fc   : > { %v1446_v60 = vpop.f32.mrb[12].mxu1 }
 0x2fd   : > { %v1448_v32 = vpop.f32.mrb[13].mxu1 }
 0x2fe   : > { %v1449_v20 = vpop.f32.mrb[14].mxu1 }
 0x2ff   : > { %v3258_v33 = vpack.c.bf16 %v1449_v20, %v1446_v60  ;;  %v1451_v34 = vpop.f32.mrb[15].mxu1 }
 0x301   : > { %2122 = vmatpush3.bf16.xpose.msra.mxu0 %v3258_v33  ;;  %2146 = vmatpush3.bf16.xpose.msra.mxu1 %v3258_v33 }
 0x302   : > { %v2326_v18 = vpop.eup %2325  ;;  %2123 = vmatprep.subr.bf16.mxu0 %v2415_v7  ;;  %2147 = vmatprep.subr.bf16.mxu1 %v2415_v7 }
 0x303   : > { %v2328_v38 = vpop.eup %2327  ;;  %v1555_v53 = vmul.f32 %v2326_v18, %v2324_v44 }
 0x304   : > { %v1454_v14 = vpop.f32.mrb[16].mxu1  ;;  %v1544_v15 = vmul.f32 0.6931472, %v2328_v38 }
 0x305   : > { %v1456_v1 = vpop.f32.mrb[17].mxu1  ;;  %v1556_v26 = vsel %vm1554_vm1, %v2326_v18, %v1555_v53 }
 0x306   : > { %v1457_v40 = vpop.f32.mrb[18].mxu1  ;;  %1771 = vadd.xlane.f32.xlu1 %v1556_v26  ;;  %v1550_v36 = vsel %vm1549_vm2, %v1547_v56, %v1544_v15 }
 0x307   : > { %v2124_v16 = vpack.c.bf16 %v1457_v40, %v1454_v14  ;;  %v1459_v39 = vpop.f32.mrb[19].mxu1  ;;  %v1551_v23 = vadd.f32 %v1550_v36, %v1541_v22 }
 0x309   : > { %2125 = vmatpush3.bf16.xpose.msra.mxu0 %v2124_v16  ;;  %2149 = vmatpush3.bf16.xpose.msra.mxu1 %v2124_v16 }
 0x30a   : > { %2126 = vmatprep.subr.bf16.mxu0 %v2415_v7  ;;  %2150 = vmatprep.subr.bf16.mxu1 %v2415_v7 }
 0x30b   : > { %1557 = vadd.xlane.f32.xlu0 %v1551_v23 }
 0x30c   : > { %v1462_v62 = vpop.f32.mrb[20].mxu1 }
 0x30d   : > { %v1464_v5 = vpop.f32.mrb[21].mxu1 }
 0x30e   : > { %v1465_v43 = vpop.f32.mrb[22].mxu1 }
 0x30f   : > { %v2127_v17 = vpack.c.bf16 %v1465_v43, %v1462_v62  ;;  %v1467_v3 = vpop.f32.mrb[23].mxu1 }
 0x311   : > { %2128 = vmatpush3.bf16.xpose.msra.mxu0 %v2127_v17  ;;  %2152 = vmatpush3.bf16.xpose.msra.mxu1 %v2127_v17 }
 0x312   : > { %2129 = vmatprep.subr.bf16.mxu0 %v2415_v7  ;;  %2153 = vmatprep.subr.bf16.mxu1 %v2415_v7 }
 0x314   : > { %v1470_v63 = vpop.f32.mrb[24].mxu1 }
 0x315   : > { %v1472_v13 = vpop.f32.mrb[25].mxu1 }
 0x316   : > { %v1473_v31 = vpop.f32.mrb[26].mxu1 }
 0x317   : > { %v2130_v59 = vpack.c.bf16 %v1473_v31, %v1470_v63  ;;  %v1475_v19 = vpop.f32.mrb[27].mxu1 }
 0x319   : > { %2131 = vmatpush3.bf16.xpose.msra.mxu0 %v2130_v59  ;;  %2155 = vmatpush3.bf16.xpose.msra.mxu1 %v2130_v59 }
 0x31a   : > { %2132 = vmatprep.subr.bf16.mxu0 %v2415_v7  ;;  %2156 = vmatprep.subr.bf16.mxu1 %v2415_v7 }
 0x31c   : > { %v1478_v21 = vpop.f32.mrb[28].mxu1 }
 0x31d   : > { %v1480_v51 = vpop.f32.mrb[29].mxu1 }
 0x31e   : > { %v1481_v6 = vpop.f32.mrb[30].mxu1 }
 0x31f   : > { %v2133_v55 = vpack.c.bf16 %v1481_v6, %v1478_v21  ;;  %v1483_v9 = vpop.f32.mrb[31].mxu1 }
 0x321   : > { %2134 = vmatpush3.bf16.xpose.msra.mxu0 %v2133_v55  ;;  %2158 = vmatpush3.bf16.xpose.msra.mxu1 %v2133_v55 }
 0x322   : > { %2159 = vmatprep.subr.bf16.mxu0 %v2415_v7 }
 0x328   : > { %2039 = vmatmul.mubr.f32.vlgmr.msra.gmra.mrb[4].mxu0 %v3237_v12  ;;  %2074 = vmatmul.mubr.f32.vlgmr.msra.gmra.mrb[32].mxu1 %v1556_v26 }
 0x329   : > { %2161 = vmatpush3.bf16.xpose.msra.mxu0 %v3240_v10  ;;  %2108 = vmatprep.mubr.msk.f32.mxu0 %vm2416_vm0, %v2417_v54 }
 0x32a   : > { %2162 = vmatprep.subr.bf16.mxu0 %v2415_v7 }
 0x331   : > { %2164 = vmatpush3.bf16.xpose.msra.mxu0 %v3246_v4 }
 0x332   : > { %2165 = vmatprep.subr.bf16.mxu0 %v2415_v7 }
 0x339   : > { %2167 = vmatpush3.bf16.xpose.msra.mxu0 %v3252_v25 }
 0x33a   : > { %2168 = vmatprep.subr.bf16.mxu0 %v2415_v7 }
 0x341   : > { %2170 = vmatpush3.bf16.xpose.msra.mxu0 %v3258_v33 }
 0x342   : > { %2171 = vmatprep.subr.bf16.mxu0 %v2415_v7 }
 0x349   : > { %2173 = vmatpush3.bf16.xpose.msra.mxu0 %v2124_v16 }
 0x34a   : > { %2174 = vmatprep.subr.bf16.mxu0 %v2415_v7 }
 0x351   : > { %2176 = vmatpush3.bf16.xpose.msra.mxu0 %v2127_v17 }
 0x352   : > { %2177 = vmatprep.subr.bf16.mxu0 %v2415_v7 }
 0x359   : > { %2179 = vmatpush3.bf16.xpose.msra.mxu0 %v2130_v59 }
 0x35a   : > { %2180 = vmatprep.subr.bf16.mxu0 %v2415_v7 }
 0x361   : > { %2182 = vmatpush3.bf16.xpose.msra.mxu0 %v2133_v55 }
 0x368   : > { %2109 = vmatmul.mubr.f32.vlgmr.msra.gmra.mrb[6].mxu0 %v2418_v57 }
 0x393   : > { %v1772_v41 = vpop.xlane.xlu1 %1771 }
 0x398   : > { %v1558_v52 = vpop.xlane.xlu0 %1557 }
 0x3fb   : > { %v1625_v54 = vpop.f32.mrb[4].mxu0  ;;  %v1696_v46 = vpop.f32.mrb[32].mxu1 }
 0x3fc   : > { %v2040_v12 = vpop.f32.mrb[5].mxu0  ;;  %v2075_v0 = vpop.f32.mrb[33].mxu1  ;;  %v1700_v7 = vmul.f32 2.0, %v1696_v46  ;;  %v1629_v61 = vsub.f32 %v1558_v52, %v1625_v54 }
 0x3fe   : > { %v1778_v35 = vadd.f32 1.0, %v1700_v7  ;;  %v1783_v2 = vmul.f32 0.0078125, %v1629_v61 }
 0x43b   : > { %v1767_v50 = vpop.f32.mrb[6].mxu0 }
 0x43c   : > { %v1776_v10 = vrot.slane %v1767_v50, %v1775_v49  ;;  %v2110_v11 = vpop.f32.mrb[7].mxu0 }
 0x43e   : > { %v1777_v29 = vadd.f32 %v1776_v10, %v1772_v41 }
 0x440   : > { %v1779_v58 = vadd.f32 1.0, %v1777_v29 }
 0x442   : > { %2329 = vrcp.f32 %v1779_v58 }
 0x44c   : > { %v2330_v4 = vpop.eup %2329 }
 0x44d   : > { %v1781_v24 = vmul.f32 %v2330_v4, %v1778_v35 }
 0x44f   : > { %v1782_v44 = vsub.f32 1.0, %v1781_v24 }
 0x451   : > { %v1784_v48 = vadd.f32 %v1783_v2, %v1782_v44 }
 0x453   : > { %1785 = vst [vmem:[%s269_s5] sm:$0xff] %v1784_v48 }
 0x454   : > { %2344 = shalt.err (!%p2341_p5)
}
 0x455   : > { %s2345_s14 = scalar_lea.hbm %s3293_s9, 128  ;;  %s2349_s24 = scalar_lea.hbm %s3344_s4, 256 }
 0x456   : > { %p2346_p6 = scmp.ne.s32.totalorder %s3293_s9, %s2345_s14  ;;  %p2350_p10 = scmp.lt.u32.totalorder %s3293_s9, %s3344_s4 }
 0x457   : > { %p2351_p11 = scmp.lt.u32.totalorder %s2349_s24, %s2345_s14  ;;  %p2353_p13 = scmp.lt.u32.totalorder %s2345_s14, %s3293_s9 }
 0x458   : > { %p2347_p7 = pnand %p2346_p6, %p2485_p4 }
 0x459   : > { %p2352_p12 = por %p2351_p11, %p2350_p10 }
 0x45a   : > { %p2348_p9 = pneg %p2347_p7 }
 0x45b   : > { %p2354_p0 = por %p2353_p13, %p2352_p12 }
 0x45d   : > { %p2355_p1 = pnand %p2354_p0, %p2348_p9 }
 0x45f   : > { %2358 = shalt.err (!%p2355_p1)
}
 0x460   : > { %2183 = dma.vmem_to_hbm [thread:$0]  (%p2485_p4), %s3295_s6, 128, %s3293_s9, %s1787_s10  }
 0x461 PF: > { %p2189_p2 = scmp.ge.s32.totalorder %s2409_s20, 2  ;;  %s1812_s30 = sand.u32 1, %s2389_s15  }
 0x462   : > { %s1813_s5 = scalar_lea.sflag [#allocation5], %s1812_s30 }
 0x463   : > { %p2186_p3 = pnand %p2189_p2, %p2492_p8 }
 0x465   : > { %2384 = dma.done.wait (!%p2186_p3), %s1813_s5, 128  }
 0x466   : > { %2386 = vsyncadd (!%p2186_p3), %s1813_s5, 4294967168  ;;  %s17_s20 = sadd.s32 1, %s2409_s20   ;;  %s3404_s15 = smov %s2393_s16 }
 0x467   : > { %p14_p5 = scmp.ge.s32.totalorder %s17_s20, 4   ;;  %s3405_s16 = smov %s2397_s17 }
 0x468   : > { %s3406_s17 = smov %s2498_s28  ;;  %s3407_s18 = smov %s2405_s19 }
 0x469   : > { %s3408_s19 = smov %s3410_s23  ;;  %16 = sbr.rel (!%p14_p5) target bundleno = 4 (0x4), region = 88 }
 0x470   :  { %1818 = vsyncpa [#allocation5], 1 }
 0x471   :  { %1820 = vsyncpa [#allocation5 + $0x1], 1 }

</bundles_post_ra>
